<compile_context>
chip_gen: v7x
topology: tpu7x:2x2x1
jax: 0.10.0
libtpu: 0.0.40
codegen_flags: <defaults>
</compile_context>

<pallas_src>
import functools

import jax
import jax.numpy as jnp
from jax.experimental import pallas as pl
from jax.experimental.pallas import tpu as pltpu


def _conv2d_im2col_kernel(x_ref, w_ref, b_ref, o_ref, pad_ref, col_ref,
                          *, KH: int, KW: int, PH: int, PW: int, stage_dtype):
    """One (batch element, Cout tile) per grid step.

    x_ref:   (1, H, W, Cin)                input tile (NHWC, unpadded)
    w_ref:   (KH*KW*Cin, CT)               im2col-ordered weight tile
    b_ref:   (1, CT)                       bias tile (f32)
    o_ref:   (1, Ho*Wo, CT)                output tile
    pad_ref: (H+2PH, W+2PW, Cin)   VMEM    zero-padded activation scratch
    col_ref: (Ho, Wo, KH*KW*Cin)   VMEM    im2col staging scratch
    Staging (pad_ref/col_ref) depends only on the batch index, so it is built
    once at co==0 and reused for every Cout tile (co axis is "arbitrary").
    """
    _, H, W, Cin = x_ref.shape
    Hp, Wp, _ = pad_ref.shape
    Ho = Hp - KH + 1
    Wo = Wp - KW + 1
    K = KH * KW * Cin

    @pl.when(pl.program_id(1) == 0)
    def _stage():
        # Zero only the halo strips; the interior is fully overwritten below.
        if PH > 0:
            pad_ref[:PH, :, :] = jnp.zeros((PH, Wp, Cin), stage_dtype)
            pad_ref[PH + H:, :, :] = jnp.zeros((Hp - PH - H, Wp, Cin), stage_dtype)
        if PW > 0:
            pad_ref[:, :PW, :] = jnp.zeros((Hp, PW, Cin), stage_dtype)
            pad_ref[:, PW + W:, :] = jnp.zeros((Hp, Wp - PW - W, Cin), stage_dtype)
        # In-kernel zero padding + single cast to the compute/staging dtype.
        pad_ref[PH:PH + H, PW:PW + W, :] = x_ref[0].astype(stage_dtype)

        # im2col: each tap is a plain shifted-window copy (no reshape per tap).
        for kh in range(KH):
            for kw in range(KW):
                t = kh * KW + kw
                col_ref[:, :, t * Cin:(t + 1) * Cin] = pad_ref[kh:kh + Ho, kw:kw + Wo, :]

    # Leading-dim merge (Ho, Wo, K) -> (Ho*Wo, K); layout-free when Wo % 8 == 0.
    lhs = col_ref[...].reshape(Ho * Wo, K)
    acc = jnp.dot(lhs, w_ref[...], preferred_element_type=jnp.float32)  # (Ho*Wo, CT)
    acc = acc + b_ref[...]                                              # f32 bias add
    o_ref[0] = acc.astype(o_ref.dtype)


def _pair(v):
    if isinstance(v, (tuple, list)):
        a, b = v
        return int(a), int(b)
    return int(v), int(v)


def extracted_func_conv2d(x_nchw, weight_oihw, bias, *, stride=1, padding=1,
                          dilation=1, groups=1, compute_dtype=None):
    """Equivalent of ExtractedFunc(F.conv2d, {weight, bias, stride=1, padding=1})."""
    sh, sw = _pair(stride)
    dh, dw = _pair(dilation)
    ph, pw = _pair(padding)
    # Fail loudly for ExtractedFunc kwargs this kernel does not implement.
    assert (sh, sw) == (1, 1), "Pallas kernel implements stride=1 only"
    assert (dh, dw) == (1, 1), "Pallas kernel implements dilation=1 only"
    assert groups == 1, "Pallas kernel implements groups=1 only"

    N, Cin, H, W = x_nchw.shape
    Cout, Cin_w, KH, KW = weight_oihw.shape
    assert Cin == Cin_w

    if bias is None:
        bias = jnp.zeros((Cout,), dtype=jnp.float32)

    Ho = H + 2 * ph - KH + 1
    Wo = W + 2 * pw - KW + 1
    K = KH * KW * Cin

    stage_dtype = jnp.dtype(compute_dtype) if compute_dtype is not None else jnp.dtype(x_nchw.dtype)

    # Lane-dense 128-wide Cout tiles only when Cout is large enough to deserve
    # them; for tiny extracted layers write exactly Cout lanes (no 16x output
    # inflation).
    if Cout >= 128:
        COUT_TILE = 128
        Cout_pad = pl.cdiv(Cout, COUT_TILE) * COUT_TILE
    else:
        COUT_TILE = Cout
        Cout_pad = Cout
    n_co = Cout_pad // COUT_TILE

    # Layout-only glue stays in plain JAX: NCHW->NHWC, OIHW->(KH*KW*Cin, Cout)
    # in im2col (kh, kw, cin) order, cast once to the staging/compute dtype.
    x_nhwc = jnp.transpose(x_nchw, (0, 2, 3, 1))
    w2d = jnp.transpose(weight_oihw, (2, 3, 1, 0)).reshape(K, Cout)
    b1d = bias.astype(jnp.float32)
    if Cout_pad != Cout:
        w2d = jnp.pad(w2d, ((0, 0), (0, Cout_pad - Cout)))
        b1d = jnp.pad(b1d, (0, Cout_pad - Cout))
    w2d = w2d.astype(stage_dtype)
    b2d = b1d.reshape(1, Cout_pad)

    bpe_x = jnp.dtype(x_nchw.dtype).itemsize
    bpe_s = stage_dtype.itemsize
    bpe_o = jnp.dtype(x_nchw.dtype).itemsize

    flops = 2 * N * Ho * Wo * Cout * K
    # x is fetched once per batch element (its block index is co-invariant);
    # weight/bias/output blocks move once per (n, co) grid step.
    bytes_accessed = (N * H * W * Cin * bpe_x
                      + N * n_co * (K * COUT_TILE * bpe_s + COUT_TILE * 4)
                      + N * n_co * Ho * Wo * COUT_TILE * bpe_o)

    # VMEM budget: persistent scratch + double-buffered blocks, with headroom.
    scratch_bytes = ((H + 2 * ph) * (W + 2 * pw) * Cin * bpe_s
                     + Ho * Wo * K * bpe_s)
    block_bytes = (H * W * Cin * bpe_x + K * COUT_TILE * bpe_s
                   + COUT_TILE * 4 + Ho * Wo * COUT_TILE * bpe_o)
    vmem_limit = int(min(64 * 1024 * 1024,
                         max(2 * (scratch_bytes + 2 * block_bytes) + (4 << 20),
                             16 * 1024 * 1024)))

    out = pl.pallas_call(
        functools.partial(_conv2d_im2col_kernel, KH=KH, KW=KW, PH=ph, PW=pw,
                          stage_dtype=stage_dtype),
        out_shape=jax.ShapeDtypeStruct((N, Ho * Wo, Cout_pad), x_nchw.dtype),
        grid=(N, n_co),
        in_specs=[
            pl.BlockSpec((1, H, W, Cin), lambda n, co: (n, 0, 0, 0)),
            pl.BlockSpec((K, COUT_TILE), lambda n, co: (0, co)),
            pl.BlockSpec((1, COUT_TILE), lambda n, co: (0, co)),
        ],
        out_specs=pl.BlockSpec((1, Ho * Wo, COUT_TILE), lambda n, co: (n, 0, co)),
        scratch_shapes=[
            pltpu.VMEM((H + 2 * ph, W + 2 * pw, Cin), stage_dtype),  # padded halo
            pltpu.VMEM((Ho, Wo, K), stage_dtype),                    # im2col tile
        ],
        # N stays "parallel" (v7x megacore); co MUST be "arbitrary" so the
        # staged scratch from co==0 is guaranteed visible to co>0 steps.
        compiler_params=pltpu.CompilerParams(
            dimension_semantics=("parallel", "arbitrary"),
            vmem_limit_bytes=vmem_limit),
        cost_estimate=pl.CostEstimate(flops=flops, transcendentals=0,
                                      bytes_accessed=bytes_accessed),
    )(x_nhwc, w2d, b2d)

    out = out[:, :, :Cout].reshape(N, Ho, Wo, Cout)   # drop lane padding (no-op if unpadded)
    return jnp.transpose(out, (0, 3, 1, 2))           # back to NCHW


if __name__ == "__main__":
    key = jax.random.PRNGKey(0)
    kx, kw, kb = jax.random.split(key, 3)

    # Small shapes consistent with the extracted conv2d: NCHW input, OIHW weight.
    N, Cin, H, W = 2, 4, 16, 16
    Cout, KH, KW = 8, 3, 3

    x = jax.random.normal(kx, (N, Cin, H, W), dtype=jnp.float32)
    weight = jax.random.normal(kw, (Cout, Cin, KH, KW), dtype=jnp.float32) * 0.1
    bias = jax.random.normal(kb, (Cout,), dtype=jnp.float32)

    # High-precision reference with the same semantics as F.conv2d(padding=1).
    ref = jax.lax.conv_general_dilated(
        x, weight, window_strides=(1, 1), padding=((1, 1), (1, 1)),
        dimension_numbers=("NCHW", "OIHW", "NCHW"),
        precision=jax.lax.Precision.HIGHEST,
    ) + bias.reshape(1, -1, 1, 1)

    # f32 staging/compute path (accuracy-sensitive NNCF comparisons).
    out_f32 = jax.block_until_ready(extracted_func_conv2d(x, weight, bias, padding=1))
    assert out_f32.shape == (N, Cout, H, W)
    assert jnp.allclose(out_f32, ref, atol=2e-2, rtol=2e-2)

    # bf16 staging / MXU path with f32 accumulation (fast path; looser tolerance).
    out_bf16 = jax.block_until_ready(
        extracted_func_conv2d(x, weight, bias, padding=1, compute_dtype=jnp.bfloat16))
    assert out_bf16.shape == (N, Cout, H, W)
    assert jnp.allclose(out_bf16, ref, atol=1e-1, rtol=1e-1)

    print("KERNEL_OK")
</pallas_src>

<mosaic_0001>
module attributes {stable_mosaic.version = 11 : i64} {
  func.func @_conv2d_im2col_kernel(%arg0: i32, %arg1: i32, %arg2: memref<1x16x16x4xf32, #tpu.memory_space<vmem>>, %arg3: memref<36x8xf32, #tpu.memory_space<vmem>>, %arg4: memref<1x8xf32, #tpu.memory_space<vmem>>, %arg5: memref<1x256x8xf32, #tpu.memory_space<vmem>>, %arg6: memref<18x18x4xf32, #tpu.memory_space<vmem>>, %arg7: memref<16x16x36xf32, #tpu.memory_space<vmem>>) attributes {dimension_semantics = [#tpu.dimension_semantics<parallel>, #tpu.dimension_semantics<arbitrary>], iteration_bounds = array<i64: 2, 1>, scalar_prefetch = 0 : i64, scratch_operands = 2 : i64, tpu.core_type = #tpu.core_type<tc>, window_params = [{transform_indices = @transform_0, window_bounds = array<i64: 1, 16, 16, 4>}, {transform_indices = @transform_1, window_bounds = array<i64: 36, 8>}, {transform_indices = @transform_2, window_bounds = array<i64: 1, 8>}, {transform_indices = @transform_3, window_bounds = array<i64: 1, 256, 8>}]} {
    %c0_i32 = arith.constant 0 : i32
    %0 = arith.cmpi eq, %arg1, %c0_i32 : i32
    %1 = arith.extui %0 : i1 to i32
    %c0_i32_0 = arith.constant 0 : i32
    %2 = arith.cmpi ne, %1, %c0_i32_0 : i32
    scf.if %2 {
      %cst_10 = arith.constant 0.000000e+00 : f32
      %13 = vector.broadcast %cst_10 : f32 to vector<1x18x4xf32>
      %c0_11 = arith.constant 0 : index
      %c0_12 = arith.constant 0 : index
      %c0_13 = arith.constant 0 : index
      %14 = vector.load %arg6[%c0_11, %c0_12, %c0_13] : memref<18x18x4xf32, #tpu.memory_space<vmem>>, vector<1x18x4xf32>
      tpu.vector_store %arg6[%c0_11, %c0_12, %c0_13], %13 {strides = array<i32>} : memref<18x18x4xf32, #tpu.memory_space<vmem>>, vector<1x18x4xf32>,
      %cst_14 = arith.constant 0.000000e+00 : f32
      %15 = vector.broadcast %cst_14 : f32 to vector<1x18x4xf32>
      %c17 = arith.constant 17 : index
      %c0_15 = arith.constant 0 : index
      %c0_16 = arith.constant 0 : index
      %16 = vector.load %arg6[%c17, %c0_15, %c0_16] : memref<18x18x4xf32, #tpu.memory_space<vmem>>, vector<1x18x4xf32>
      tpu.vector_store %arg6[%c17, %c0_15, %c0_16], %15 {strides = array<i32>} : memref<18x18x4xf32, #tpu.memory_space<vmem>>, vector<1x18x4xf32>,
      %cst_17 = arith.constant 0.000000e+00 : f32
      %17 = vector.broadcast %cst_17 : f32 to vector<18x1x4xf32>
      %c0_18 = arith.constant 0 : index
      %c0_19 = arith.constant 0 : index
      %c0_20 = arith.constant 0 : index
      %18 = vector.load %arg6[%c0_18, %c0_19, %c0_20] : memref<18x18x4xf32, #tpu.memory_space<vmem>>, vector<18x1x4xf32>
      tpu.vector_store %arg6[%c0_18, %c0_19, %c0_20], %17 {strides = array<i32>} : memref<18x18x4xf32, #tpu.memory_space<vmem>>, vector<18x1x4xf32>,
      %cst_21 = arith.constant 0.000000e+00 : f32
      %19 = vector.broadcast %cst_21 : f32 to vector<18x1x4xf32>
      %c0_22 = arith.constant 0 : index
      %c17_23 = arith.constant 17 : index
      %c0_24 = arith.constant 0 : index
      %20 = vector.load %arg6[%c0_22, %c17_23, %c0_24] : memref<18x18x4xf32, #tpu.memory_space<vmem>>, vector<18x1x4xf32>
      tpu.vector_store %arg6[%c0_22, %c17_23, %c0_24], %19 {strides = array<i32>} : memref<18x18x4xf32, #tpu.memory_space<vmem>>, vector<18x1x4xf32>,
      %c0_25 = arith.constant 0 : index
      %c0_26 = arith.constant 0 : index
      %c0_27 = arith.constant 0 : index
      %c0_28 = arith.constant 0 : index
      %21 = vector.load %arg2[%c0_25, %c0_26, %c0_27, %c0_28] : memref<1x16x16x4xf32, #tpu.memory_space<vmem>>, vector<1x16x16x4xf32>
      %22 = vector.shape_cast %21 : vector<1x16x16x4xf32> to vector<16x16x4xf32>
      %c1 = arith.constant 1 : index
      %c1_29 = arith.constant 1 : index
      %c0_30 = arith.constant 0 : index
      %23 = vector.load %arg6[%c1, %c1_29, %c0_30] : memref<18x18x4xf32, #tpu.memory_space<vmem>>, vector<16x16x4xf32>
      tpu.vector_store %arg6[%c1, %c1_29, %c0_30], %22 {strides = array<i32>} : memref<18x18x4xf32, #tpu.memory_space<vmem>>, vector<16x16x4xf32>,
      %c0_31 = arith.constant 0 : index
      %c0_32 = arith.constant 0 : index
      %c0_33 = arith.constant 0 : index
      %24 = vector.load %arg6[%c0_31, %c0_32, %c0_33] : memref<18x18x4xf32, #tpu.memory_space<vmem>>, vector<16x16x4xf32>
      %c0_34 = arith.constant 0 : index
      %c0_35 = arith.constant 0 : index
      %c0_36 = arith.constant 0 : index
      %25 = vector.load %arg7[%c0_34, %c0_35, %c0_36] : memref<16x16x36xf32, #tpu.memory_space<vmem>>, vector<16x16x4xf32>
      tpu.vector_store %arg7[%c0_34, %c0_35, %c0_36], %24 {strides = array<i32>} : memref<16x16x36xf32, #tpu.memory_space<vmem>>, vector<16x16x4xf32>,
      %c0_37 = arith.constant 0 : index
      %c1_38 = arith.constant 1 : index
      %c0_39 = arith.constant 0 : index
      %26 = vector.load %arg6[%c0_37, %c1_38, %c0_39] : memref<18x18x4xf32, #tpu.memory_space<vmem>>, vector<16x16x4xf32>
      %c0_40 = arith.constant 0 : index
      %c0_41 = arith.constant 0 : index
      %c4 = arith.constant 4 : index
      %27 = vector.load %arg7[%c0_40, %c0_41, %c4] : memref<16x16x36xf32, #tpu.memory_space<vmem>>, vector<16x16x4xf32>
      tpu.vector_store %arg7[%c0_40, %c0_41, %c4], %26 {strides = array<i32>} : memref<16x16x36xf32, #tpu.memory_space<vmem>>, vector<16x16x4xf32>,
      %c0_42 = arith.constant 0 : index
      %c2 = arith.constant 2 : index
      %c0_43 = arith.constant 0 : index
      %28 = vector.load %arg6[%c0_42, %c2, %c0_43] : memref<18x18x4xf32, #tpu.memory_space<vmem>>, vector<16x16x4xf32>
      %c0_44 = arith.constant 0 : index
      %c0_45 = arith.constant 0 : index
      %c8 = arith.constant 8 : index
      %29 = vector.load %arg7[%c0_44, %c0_45, %c8] : memref<16x16x36xf32, #tpu.memory_space<vmem>>, vector<16x16x4xf32>
      tpu.vector_store %arg7[%c0_44, %c0_45, %c8], %28 {strides = array<i32>} : memref<16x16x36xf32, #tpu.memory_space<vmem>>, vector<16x16x4xf32>,
      %c1_46 = arith.constant 1 : index
      %c0_47 = arith.constant 0 : index
      %c0_48 = arith.constant 0 : index
      %30 = vector.load %arg6[%c1_46, %c0_47, %c0_48] : memref<18x18x4xf32, #tpu.memory_space<vmem>>, vector<16x16x4xf32>
      %c0_49 = arith.constant 0 : index
      %c0_50 = arith.constant 0 : index
      %c12 = arith.constant 12 : index
      %31 = vector.load %arg7[%c0_49, %c0_50, %c12] : memref<16x16x36xf32, #tpu.memory_space<vmem>>, vector<16x16x4xf32>
      tpu.vector_store %arg7[%c0_49, %c0_50, %c12], %30 {strides = array<i32>} : memref<16x16x36xf32, #tpu.memory_space<vmem>>, vector<16x16x4xf32>,
      %c1_51 = arith.constant 1 : index
      %c1_52 = arith.constant 1 : index
      %c0_53 = arith.constant 0 : index
      %32 = vector.load %arg6[%c1_51, %c1_52, %c0_53] : memref<18x18x4xf32, #tpu.memory_space<vmem>>, vector<16x16x4xf32>
      %c0_54 = arith.constant 0 : index
      %c0_55 = arith.constant 0 : index
      %c16 = arith.constant 16 : index
      %33 = vector.load %arg7[%c0_54, %c0_55, %c16] : memref<16x16x36xf32, #tpu.memory_space<vmem>>, vector<16x16x4xf32>
      tpu.vector_store %arg7[%c0_54, %c0_55, %c16], %32 {strides = array<i32>} : memref<16x16x36xf32, #tpu.memory_space<vmem>>, vector<16x16x4xf32>,
      %c1_56 = arith.constant 1 : index
      %c2_57 = arith.constant 2 : index
      %c0_58 = arith.constant 0 : index
      %34 = vector.load %arg6[%c1_56, %c2_57, %c0_58] : memref<18x18x4xf32, #tpu.memory_space<vmem>>, vector<16x16x4xf32>
      %c0_59 = arith.constant 0 : index
      %c0_60 = arith.constant 0 : index
      %c20 = arith.constant 20 : index
      %35 = vector.load %arg7[%c0_59, %c0_60, %c20] : memref<16x16x36xf32, #tpu.memory_space<vmem>>, vector<16x16x4xf32>
      tpu.vector_store %arg7[%c0_59, %c0_60, %c20], %34 {strides = array<i32>} : memref<16x16x36xf32, #tpu.memory_space<vmem>>, vector<16x16x4xf32>,
      %c2_61 = arith.constant 2 : index
      %c0_62 = arith.constant 0 : index
      %c0_63 = arith.constant 0 : index
      %36 = vector.load %arg6[%c2_61, %c0_62, %c0_63] : memref<18x18x4xf32, #tpu.memory_space<vmem>>, vector<16x16x4xf32>
      %c0_64 = arith.constant 0 : index
      %c0_65 = arith.constant 0 : index
      %c24 = arith.constant 24 : index
      %37 = vector.load %arg7[%c0_64, %c0_65, %c24] : memref<16x16x36xf32, #tpu.memory_space<vmem>>, vector<16x16x4xf32>
      tpu.vector_store %arg7[%c0_64, %c0_65, %c24], %36 {strides = array<i32>} : memref<16x16x36xf32, #tpu.memory_space<vmem>>, vector<16x16x4xf32>,
      %c2_66 = arith.constant 2 : index
      %c1_67 = arith.constant 1 : index
      %c0_68 = arith.constant 0 : index
      %38 = vector.load %arg6[%c2_66, %c1_67, %c0_68] : memref<18x18x4xf32, #tpu.memory_space<vmem>>, vector<16x16x4xf32>
      %c0_69 = arith.constant 0 : index
      %c0_70 = arith.constant 0 : index
      %c28 = arith.constant 28 : index
      %39 = vector.load %arg7[%c0_69, %c0_70, %c28] : memref<16x16x36xf32, #tpu.memory_space<vmem>>, vector<16x16x4xf32>
      tpu.vector_store %arg7[%c0_69, %c0_70, %c28], %38 {strides = array<i32>} : memref<16x16x36xf32, #tpu.memory_space<vmem>>, vector<16x16x4xf32>,
      %c2_71 = arith.constant 2 : index
      %c2_72 = arith.constant 2 : index
      %c0_73 = arith.constant 0 : index
      %40 = vector.load %arg6[%c2_71, %c2_72, %c0_73] : memref<18x18x4xf32, #tpu.memory_space<vmem>>, vector<16x16x4xf32>
      %c0_74 = arith.constant 0 : index
      %c0_75 = arith.constant 0 : index
      %c32 = arith.constant 32 : index
      %41 = vector.load %arg7[%c0_74, %c0_75, %c32] : memref<16x16x36xf32, #tpu.memory_space<vmem>>, vector<16x16x4xf32>
      tpu.vector_store %arg7[%c0_74, %c0_75, %c32], %40 {strides = array<i32>} : memref<16x16x36xf32, #tpu.memory_space<vmem>>, vector<16x16x4xf32>,
    } else {
    }
    %c0 = arith.constant 0 : index
    %c0_1 = arith.constant 0 : index
    %c0_2 = arith.constant 0 : index
    %3 = vector.load %arg7[%c0, %c0_1, %c0_2] : memref<16x16x36xf32, #tpu.memory_space<vmem>>, vector<16x16x36xf32>
    %4 = vector.shape_cast %3 : vector<16x16x36xf32> to vector<256x36xf32>
    %c0_3 = arith.constant 0 : index
    %c0_4 = arith.constant 0 : index
    %5 = vector.load %arg3[%c0_3, %c0_4] : memref<36x8xf32, #tpu.memory_space<vmem>>, vector<36x8xf32>
    %cst = arith.constant dense<0.000000e+00> : vector<256x8xf32>
    %6 = tpu.matmul %4, %5, %cst {dimension_numbers = #tpu.dot_dimension_numbers<[1], [0], [0], [1], [0, 0, 1, 1], [], []>} : vector<256x36xf32>, vector<36x8xf32>, vector<256x8xf32> -> vector<256x8xf32>
    %c0_5 = arith.constant 0 : index
    %c0_6 = arith.constant 0 : index
    %7 = vector.load %arg4[%c0_5, %c0_6] : memref<1x8xf32, #tpu.memory_space<vmem>>, vector<1x8xf32>
    %8 = vector.broadcast %7 : vector<1x8xf32> to vector<256x8xf32>
    %9 = arith.addf %6, %8 : vector<256x8xf32>
    %c0_7 = arith.constant 0 : index
    %c0_8 = arith.constant 0 : index
    %c0_9 = arith.constant 0 : index
    %10 = vector.load %arg5[%c0_7, %c0_8, %c0_9] : memref<1x256x8xf32, #tpu.memory_space<vmem>>, vector<1x256x8xf32>
    %11 = vector.shape_cast %10 : vector<1x256x8xf32> to vector<256x8xf32>
    %12 = vector.shape_cast %9 : vector<256x8xf32> to vector<1x256x8xf32>
    tpu.vector_store %arg5[%c0_7, %c0_8, %c0_9], %12 {strides = array<i32>} : memref<1x256x8xf32, #tpu.memory_space<vmem>>, vector<1x256x8xf32>,
    return
  }
  func.func @transform_0(%arg0: i32, %arg1: i32) -> (i32, i32, i32, i32) {
    %c0_i32 = arith.constant 0 : i32
    %c0_i32_0 = arith.constant 0 : i32
    %c0_i32_1 = arith.constant 0 : i32
    %c0_i32_2 = arith.constant 0 : i32
    return %arg0, %c0_i32, %c0_i32_0, %c0_i32_1 : i32, i32, i32, i32
  }
  func.func @transform_1(%arg0: i32, %arg1: i32) -> (i32, i32) {
    %c0_i32 = arith.constant 0 : i32
    %c0_i32_0 = arith.constant 0 : i32
    return %c0_i32, %arg1 : i32, i32
  }
  func.func @transform_2(%arg0: i32, %arg1: i32) -> (i32, i32) {
    %c0_i32 = arith.constant 0 : i32
    %c0_i32_0 = arith.constant 0 : i32
    return %c0_i32, %arg1 : i32, i32
  }
  func.func @transform_3(%arg0: i32, %arg1: i32) -> (i32, i32, i32) {
    %c0_i32 = arith.constant 0 : i32
    %c0_i32_0 = arith.constant 0 : i32
    return %arg0, %c0_i32, %arg1 : i32, i32, i32
  }
}

</mosaic_0001>

<bundles_post_ra>
// kernel: tpu_custom_call.1
= control target key start
LH: loop header
LB: loop body
LE: loop exit
PB: predicated region body
PF: predicated region fallthrough
CT: control target
= control target key end

     0   :  { %s2698_s12 = smov 0   ;;  %s2700_s13 = smov 0   ;;  %s3800_s0 = inlined_call_operand.vmem [shape: f32[2,16,16,4], index: 0, kind: input, shape index: {}]   ;;  %s3801_s1 = inlined_call_operand.vmem [shape: f32[36,8], index: 1, kind: input, shape index: {}]   ;;  %s3802_s2 = inlined_call_operand.vmem [shape: f32[1,8], index: 2, kind: input, shape index: {}]   ;;  %s3803_s3 = inlined_call_operand.vmem [shape: f32[2,256,8], index: 3, kind: output, shape index: {}]  }
   0x1   :  { %s2702_s14 = smov 0  }
   0x2 LB: > { %s25_s15 = sadd.s32 1, %s2663_s13  ;;  %p2460_p0 = scmp.ge.s32.totalorder %s2667_s14, 1  ;;  %s2667_s14 = sphi %s2702_s14, %s13_s14   ;;  %s2663_s13 = sphi %s2700_s13, %s3805_s13   ;;  %s2659_s12 = sphi %s2698_s12, %s3804_s12  }
   0x3   : > { %p27_p1 = scmp.ge.s32.totalorder %s25_s15, 2  ;;  %p168_p2 = scmp.lt.s32.totalorder %s2667_s14, 3 }
   0x5   : > { %s3807_s15 = smov (%p27_p1, %s25_s15), 0  ;;  %p169_p3 = pnand %p2460_p0, %p168_p2 }
   0x6   : > { %vm226_vm0 = vcmask (!%p169_p3), 31744   ;;  %vm235_vm1 = vcmask (!%p169_p3), 24576   ;;  %p202_p4 = scmp.lt.s32.totalorder (!%p169_p3), %s2659_s12, 1  ;;  %vm229_vm2 = vcmask (!%p169_p3), 25600   ;;  %v2669_v0 = vmov (!%p169_p3), 0.0   ;;  %s2670_s20 = smov (!%p169_p3), 4  }
   0x7   : > { %172 = sbr.rel (%p169_p3) target bundleno = 883 (0x373), region = 32  ;;  %227 = vst.msk [vmem:[#allocation2] sm:$0xff] (!%p169_p3), %vm226_vm0, %v2669_v0  ;;  %228 = vst.msk [vmem:[#allocation2 + $0x8] sm:$0xff] (!%p169_p3), %vm226_vm0, %v2669_v0  ;;  %s2671_s21 = smov (!%p169_p3), 8   ;;  %vm561_vm3 = vcmask (!%p169_p3), 64544   ;;  %vm754_vm4 = vcmask (!%p169_p3), 97344  }
   0x8   : > { %232 = vst.msk [vmem:[#allocation2 + $0x198] sm:$0xff] (!%p169_p3), %vm226_vm0, %v2669_v0  ;;  %233 = vst.msk [vmem:[#allocation2 + $0x1a0] sm:$0xff] (!%p169_p3), %vm226_vm0, %v2669_v0  ;;  %s2672_s22 = smov (!%p169_p3), 12   ;;  %s2673_s23 = smov (!%p169_p3), 16   ;;  %vm2087_vm5 = vcmask (!%p169_p3), 1043456   ;;  %vm947_vm6 = vcmask (!%p169_p3), 130144  }
   0x9   : > { %237 = vst.msk [vmem:[#allocation2 + $0x18] sm:$0x1] (!%p169_p3), %vm235_vm1, %v2669_v0  ;;  %238 = vst.msk [vmem:[#allocation2 + $0x30] sm:$0x1] (!%p169_p3), %vm235_vm1, %v2669_v0  ;;  %s2674_s24 = smov (!%p169_p3), 20   ;;  %s2675_s25 = smov (!%p169_p3), 24  }
   0xa   : > { %239 = vst.msk [vmem:[#allocation2 + $0x48] sm:$0x1] (!%p169_p3), %vm235_vm1, %v2669_v0  ;;  %240 = vst.msk [vmem:[#allocation2 + $0x60] sm:$0x1] (!%p169_p3), %vm235_vm1, %v2669_v0  ;;  %s2676_s26 = smov (!%p169_p3), 28   ;;  %s2677_s4 = smov (!%p169_p3), 32  }
   0xb   : > { %241 = vst.msk [vmem:[#allocation2 + $0x78] sm:$0x1] (!%p169_p3), %vm235_vm1, %v2669_v0  ;;  %242 = vst.msk [vmem:[#allocation2 + $0x90] sm:$0x1] (!%p169_p3), %vm235_vm1, %v2669_v0  ;;  %vm1140_vm7 = vcmask (!%p169_p3), 162944   ;;  %vm1333_vm8 = vcmask (!%p169_p3), 195744  }
   0xc   : > { %243 = vst.msk [vmem:[#allocation2 + $0xa8] sm:$0x1] (!%p169_p3), %vm235_vm1, %v2669_v0  ;;  %244 = vst.msk [vmem:[#allocation2 + $0xc0] sm:$0x1] (!%p169_p3), %vm235_vm1, %v2669_v0  ;;  %vm1527_vm9 = vcmask (!%p169_p3), 228544   ;;  %vm1720_vm10 = vcmask (!%p169_p3), 261344  }
   0xd   : > { %245 = vst.msk [vmem:[#allocation2 + $0xd8] sm:$0x1] (!%p169_p3), %vm235_vm1, %v2669_v0  ;;  %246 = vst.msk [vmem:[#allocation2 + $0xf0] sm:$0x1] (!%p169_p3), %vm235_vm1, %v2669_v0  ;;  %vm1913_vm11 = vcmask (!%p169_p3), 294144   ;;  %vm1990_vm12 = vcmask (!%p169_p3), 293888  }
   0xe   : > { %247 = vst.msk [vmem:[#allocation2 + $0x108] sm:$0x1] %vm235_vm1, %v2669_v0  ;;  %248 = vst.msk [vmem:[#allocation2 + $0x120] sm:$0x1] %vm235_vm1, %v2669_v0  ;;  %s3809_s12 = smov (!%p202_p4, %s2659_s12), 1  ;;  %v401_v7 = vld [vmem:[#allocation2 + $0x1] sm:$0xff] }
   0xf   : > { %249 = vst.msk [vmem:[#allocation2 + $0x138] sm:$0x1] %vm235_vm1, %v2669_v0  ;;  %250 = vst.msk [vmem:[#allocation2 + $0x150] sm:$0x1] %vm235_vm1, %v2669_v0  ;;  %s2501_s16 = sshll.u32 %s3809_s12, 8  ;;  %465 = vrot.lane.b32.xlu0 %v401_v7, %s2670_s20  ;;  %v338_v48 = vld [vmem:[#allocation2 + $0x8] sm:$0xff] }
  0x10   : > { %251 = vst.msk [vmem:[#allocation2 + $0x168] sm:$0x1] %vm235_vm1, %v2669_v0  ;;  %252 = vst.msk [vmem:[#allocation2 + $0x180] sm:$0x1] %vm235_vm1, %v2669_v0  ;;  %s2772_s19 = scalar_lea.vmem %s3800_s0, %s2501_s16  ;;  %vm2316_vm13 = vcmask 64512  }
  0x11   : > { %255 = vst.msk [vmem:[#allocation2 + $0x29] sm:$0x1] %vm235_vm1, %v2669_v0  ;;  %256 = vst.msk [vmem:[#allocation2 + $0x41] sm:$0x1] %vm235_vm1, %v2669_v0  ;;  %v272_v1 = vld [vmem:[%s2772_s19] sm:$0xff]  ;;  %v273_v2 = vld [vmem:[%s2772_s19 + $0x8] sm:$0xff] }
  0x12   : > { %257 = vst.msk [vmem:[#allocation2 + $0x59] sm:$0x1] %vm235_vm1, %v2669_v0  ;;  %258 = vst.msk [vmem:[#allocation2 + $0x71] sm:$0x1] %vm235_vm1, %v2669_v0  ;;  %v274_v3 = vld [vmem:[%s2772_s19 + $0x10] sm:$0xff]  ;;  %v275_v4 = vld [vmem:[%s2772_s19 + $0x18] sm:$0xff] }
  0x13   : > { %259 = vst.msk [vmem:[#allocation2 + $0x89] sm:$0x1] %vm235_vm1, %v2669_v0  ;;  %260 = vst.msk [vmem:[#allocation2 + $0xa1] sm:$0x1] %vm235_vm1, %v2669_v0  ;;  %v276_v5 = vld [vmem:[%s2772_s19 + $0x20] sm:$0xff]  ;;  %v277_v6 = vld [vmem:[%s2772_s19 + $0x28] sm:$0xff] }
  0x14   : > { %261 = vst.msk [vmem:[#allocation2 + $0xb9] sm:$0x1] %vm235_vm1, %v2669_v0  ;;  %262 = vst.msk [vmem:[#allocation2 + $0xd1] sm:$0x1] %vm235_vm1, %v2669_v0  ;;  %v278_v9 = vld [vmem:[%s2772_s19 + $0x30] sm:$0xff]  ;;  %v279_v10 = vld [vmem:[%s2772_s19 + $0x38] sm:$0xff] }
  0x15   : > { %263 = vst.msk [vmem:[#allocation2 + $0xe9] sm:$0x1] %vm235_vm1, %v2669_v0  ;;  %264 = vst.msk [vmem:[#allocation2 + $0x101] sm:$0x1] %vm235_vm1, %v2669_v0  ;;  %v280_v11 = vld [vmem:[%s2772_s19 + $0x40] sm:$0xff]  ;;  %v281_v12 = vld [vmem:[%s2772_s19 + $0x48] sm:$0xff] }
  0x16   : > { %265 = vst.msk [vmem:[#allocation2 + $0x119] sm:$0x1] %vm235_vm1, %v2669_v0  ;;  %266 = vst.msk [vmem:[#allocation2 + $0x131] sm:$0x1] %vm235_vm1, %v2669_v0  ;;  %v282_v13 = vld [vmem:[%s2772_s19 + $0x50] sm:$0xff]  ;;  %v283_v14 = vld [vmem:[%s2772_s19 + $0x58] sm:$0xff] }
  0x17   : > { %267 = vst.msk [vmem:[#allocation2 + $0x149] sm:$0x1] %vm235_vm1, %v2669_v0  ;;  %268 = vst.msk [vmem:[#allocation2 + $0x161] sm:$0x1] %vm235_vm1, %v2669_v0  ;;  %v284_v15 = vld [vmem:[%s2772_s19 + $0x60] sm:$0xff]  ;;  %v285_v16 = vld [vmem:[%s2772_s19 + $0x68] sm:$0xff] }
  0x18   : > { %269 = vst.msk [vmem:[#allocation2 + $0x179] sm:$0x1] %vm235_vm1, %v2669_v0  ;;  %270 = vst.msk [vmem:[#allocation2 + $0x191] sm:$0x1] %vm235_vm1, %v2669_v0  ;;  %v286_v17 = vld [vmem:[%s2772_s19 + $0x70] sm:$0xff]  ;;  %v287_v18 = vld [vmem:[%s2772_s19 + $0x78] sm:$0xff] }
  0x19   : > { %230 = vst.msk [vmem:[#allocation2 + $0x10] sm:$0x3] %vm229_vm2, %v2669_v0  ;;  %234 = vst.msk [vmem:[#allocation2 + $0x1a8] sm:$0x3] %vm229_vm2, %v2669_v0  ;;  %v288_v19 = vld [vmem:[%s2772_s19 + $0x80] sm:$0xff]  ;;  %v289_v20 = vld [vmem:[%s2772_s19 + $0x88] sm:$0xff] }
  0x1a   : > { %236 = vst.msk [vmem:[#allocation2] sm:$0x1] %vm235_vm1, %v2669_v0  ;;  %253 = vst.msk [vmem:[#allocation2 + $0x198] sm:$0x1] %vm235_vm1, %v2669_v0  ;;  %v290_v21 = vld [vmem:[%s2772_s19 + $0x90] sm:$0xff]  ;;  %v291_v22 = vld [vmem:[%s2772_s19 + $0x98] sm:$0xff] }
  0x1b   : > { %254 = vst.msk [vmem:[#allocation2 + $0x11] sm:$0x1] %vm235_vm1, %v2669_v0  ;;  %271 = vst.msk [vmem:[#allocation2 + $0x1a9] sm:$0x1] %vm235_vm1, %v2669_v0  ;;  %v292_v23 = vld [vmem:[%s2772_s19 + $0xa0] sm:$0xff]  ;;  %v293_v24 = vld [vmem:[%s2772_s19 + $0xa8] sm:$0xff] }
  0x1c   : > { %305 = vst.msk [vmem:[#allocation2 + $0x19] sm:$0xff] %vm226_vm0, %v272_v1  ;;  %306 = vst.msk [vmem:[#allocation2 + $0x21] sm:$0xff] %vm226_vm0, %v273_v2  ;;  %v294_v28 = vld [vmem:[%s2772_s19 + $0xb0] sm:$0xff]  ;;  %v295_v29 = vld [vmem:[%s2772_s19 + $0xb8] sm:$0xff] }
  0x1d   : > { %307 = vst.msk [vmem:[#allocation2 + $0x31] sm:$0xff] %vm226_vm0, %v274_v3  ;;  %308 = vst.msk [vmem:[#allocation2 + $0x39] sm:$0xff] %vm226_vm0, %v275_v4  ;;  %v296_v33 = vld [vmem:[%s2772_s19 + $0xc0] sm:$0xff]  ;;  %v297_v34 = vld [vmem:[%s2772_s19 + $0xc8] sm:$0xff] }
  0x1e   : > { %309 = vst.msk [vmem:[#allocation2 + $0x49] sm:$0xff] %vm226_vm0, %v276_v5  ;;  %310 = vst.msk [vmem:[#allocation2 + $0x51] sm:$0xff] %vm226_vm0, %v277_v6  ;;  %v298_v35 = vld [vmem:[%s2772_s19 + $0xd0] sm:$0xff]  ;;  %v299_v36 = vld [vmem:[%s2772_s19 + $0xd8] sm:$0xff] }
  0x1f   : > { %311 = vst.msk [vmem:[#allocation2 + $0x61] sm:$0xff] %vm226_vm0, %v278_v9  ;;  %312 = vst.msk [vmem:[#allocation2 + $0x69] sm:$0xff] %vm226_vm0, %v279_v10  ;;  %v300_v37 = vld [vmem:[%s2772_s19 + $0xe0] sm:$0xff]  ;;  %v301_v38 = vld [vmem:[%s2772_s19 + $0xe8] sm:$0xff] }
  0x20   : > { %v402_v8 = vld [vmem:[#allocation2 + $0x9] sm:$0xff]  ;;  %313 = vst.msk [vmem:[#allocation2 + $0x79] sm:$0xff] %vm226_vm0, %v280_v11  ;;  %314 = vst.msk [vmem:[#allocation2 + $0x81] sm:$0xff] %vm226_vm0, %v281_v12 }
  0x21   : > { %315 = vst.msk [vmem:[#allocation2 + $0x91] sm:$0xff] %vm226_vm0, %v282_v13  ;;  %316 = vst.msk [vmem:[#allocation2 + $0x99] sm:$0xff] %vm226_vm0, %v283_v14  ;;  %467 = vrot.lane.b32.xlu0 %v402_v8, %s2670_s20  ;;  %v337_v45 = vld [vmem:[#allocation2] sm:$0xff] }
  0x22   : > { %317 = vst.msk [vmem:[#allocation2 + $0xa9] sm:$0xff] %vm226_vm0, %v284_v15  ;;  %318 = vst.msk [vmem:[#allocation2 + $0xb1] sm:$0xff] %vm226_vm0, %v285_v16 }
  0x23   : > { %319 = vst.msk [vmem:[#allocation2 + $0xc1] sm:$0xff] %vm226_vm0, %v286_v17  ;;  %320 = vst.msk [vmem:[#allocation2 + $0xc9] sm:$0xff] %vm226_vm0, %v287_v18  ;;  %v2817_v25 = vld [vmem:[#allocation2 + $0x19] sm:$0xff]  ;;  %v2826_v27 = vld [vmem:[#allocation2 + $0x21] sm:$0xff] }
  0x24   : > { %321 = vst.msk [vmem:[#allocation2 + $0xd9] sm:$0xff] %vm226_vm0, %v288_v19  ;;  %322 = vst.msk [vmem:[#allocation2 + $0xe1] sm:$0xff] %vm226_vm0, %v289_v20  ;;  %v2819_v26 = vld [vmem:[#allocation2 + $0x31] sm:$0xff]  ;;  %469 = vrot.lane.b32.xlu1 %v2817_v25, %s2670_s20  ;;  %v2836_v31 = vld [vmem:[#allocation2 + $0x39] sm:$0xff] }
  0x25   : > { %323 = vst.msk [vmem:[#allocation2 + $0xf1] sm:$0xff] %vm226_vm0, %v290_v21  ;;  %324 = vst.msk [vmem:[#allocation2 + $0xf9] sm:$0xff] %vm226_vm0, %v291_v22  ;;  %473 = vrot.lane.b32.xlu0 %v2819_v26, %s2670_s20  ;;  %v407_v30 = vld [vmem:[#allocation2 + $0x49] sm:$0xff]  ;;  %v408_v39 = vld [vmem:[#allocation2 + $0x51] sm:$0xff] }
  0x26   : > { %325 = vst.msk [vmem:[#allocation2 + $0x109] sm:$0xff] %vm226_vm0, %v292_v23  ;;  %326 = vst.msk [vmem:[#allocation2 + $0x111] sm:$0xff] %vm226_vm0, %v293_v24  ;;  %v409_v32 = vld [vmem:[#allocation2 + $0x61] sm:$0xff]  ;;  %v410_v41 = vld [vmem:[#allocation2 + $0x69] sm:$0xff] }
  0x27   : > { %327 = vst.msk [vmem:[#allocation2 + $0x121] sm:$0xff] %vm226_vm0, %v294_v28  ;;  %328 = vst.msk [vmem:[#allocation2 + $0x129] sm:$0xff] %vm226_vm0, %v295_v29  ;;  %v411_v40 = vld [vmem:[#allocation2 + $0x79] sm:$0xff]  ;;  %v412_v43 = vld [vmem:[#allocation2 + $0x81] sm:$0xff] }
  0x28   : > { %471 = vrot.lane.b32.xlu1 %v2826_v27, %s2670_s20  ;;  %329 = vst.msk [vmem:[#allocation2 + $0x139] sm:$0xff] %vm226_vm0, %v296_v33  ;;  %330 = vst.msk [vmem:[#allocation2 + $0x141] sm:$0xff] %vm226_vm0, %v297_v34  ;;  %v413_v42 = vld [vmem:[#allocation2 + $0x91] sm:$0xff]  ;;  %v414_v47 = vld [vmem:[#allocation2 + $0x99] sm:$0xff] }
  0x29   : > { %477 = vrot.lane.b32.xlu0 %v407_v30, %s2670_s20  ;;  %331 = vst.msk [vmem:[#allocation2 + $0x151] sm:$0xff] %vm226_vm0, %v298_v35  ;;  %332 = vst.msk [vmem:[#allocation2 + $0x159] sm:$0xff] %vm226_vm0, %v299_v36  ;;  %v415_v44 = vld [vmem:[#allocation2 + $0xa9] sm:$0xff]  ;;  %v2859_v46 = vld [vmem:[#allocation2 + $0x18] sm:$0xff] }
  0x2a   : > { %333 = vst.msk [vmem:[#allocation2 + $0x169] sm:$0xff] %vm226_vm0, %v300_v37  ;;  %334 = vst.msk [vmem:[#allocation2 + $0x171] sm:$0xff] %vm226_vm0, %v301_v38  ;;  %v2866_v49 = vld [vmem:[#allocation2 + $0x20] sm:$0xff]  ;;  %v2870_v51 = vld [vmem:[#allocation2 + $0x30] sm:$0xff] }
  0x2b   : > { %369 = vst.msk [vmem:[#allocation3] sm:$0xff] %vm226_vm0, %v337_v45  ;;  %371 = vst.msk [vmem:[#allocation3 + $0x10] sm:$0xff] %vm226_vm0, %v2859_v46  ;;  %v417_v50 = vld [vmem:[#allocation2 + $0xc1] sm:$0xff]  ;;  %v2872_v52 = vld [vmem:[#allocation2 + $0x38] sm:$0xff] }
  0x2c   : > { %475 = vrot.lane.b32.xlu1 %v2836_v31, %s2670_s20  ;;  %370 = vst.msk [vmem:[#allocation3 + $0x8] sm:$0xff] %vm226_vm0, %v338_v48  ;;  %372 = vst.msk [vmem:[#allocation3 + $0x18] sm:$0xff] %vm226_vm0, %v2866_v49  ;;  %v416_v53 = vld [vmem:[#allocation2 + $0xb1] sm:$0xff]  ;;  %v2879_v54 = vld [vmem:[#allocation2 + $0x48] sm:$0xff] }
  0x2d   : > { %481 = vrot.lane.b32.xlu0 %v409_v32, %s2670_s20  ;;  %373 = vst.msk [vmem:[#allocation3 + $0x20] sm:$0xff] %vm226_vm0, %v2870_v51  ;;  %374 = vst.msk [vmem:[#allocation3 + $0x28] sm:$0xff] %vm226_vm0, %v2872_v52  ;;  %v2881_v55 = vld [vmem:[#allocation2 + $0x50] sm:$0xff]  ;;  %v2883_v56 = vld [vmem:[#allocation2 + $0xd9] sm:$0xff] }
  0x2e   : > { %375 = vst.msk [vmem:[#allocation3 + $0x30] sm:$0xff] %vm226_vm0, %v2879_v54  ;;  %376 = vst.msk [vmem:[#allocation3 + $0x38] sm:$0xff] %vm226_vm0, %v2881_v55  ;;  %v2889_v57 = vld [vmem:[#allocation2 + $0x60] sm:$0xff]  ;;  %v2891_v58 = vld [vmem:[#allocation2 + $0x68] sm:$0xff] }
  0x2f   : > { %v2893_v59 = vld [vmem:[#allocation2 + $0x78] sm:$0xff]  ;;  %377 = vst.msk [vmem:[#allocation3 + $0x40] sm:$0xff] %vm226_vm0, %v2889_v57  ;;  %378 = vst.msk [vmem:[#allocation3 + $0x48] sm:$0xff] %vm226_vm0, %v2891_v58  ;;  %v2902_v60 = vld [vmem:[#allocation2 + $0x80] sm:$0xff] }
  0x30   : > { %479 = vrot.lane.b32.xlu1 %v408_v39, %s2670_s20  ;;  %379 = vst.msk [vmem:[#allocation3 + $0x50] sm:$0xff] %vm226_vm0, %v2893_v59  ;;  %v2904_v61 = vld [vmem:[#allocation2 + $0x90] sm:$0xff]  ;;  %v2906_v62 = vld [vmem:[#allocation2 + $0x98] sm:$0xff]  ;;  %380 = vst.msk [vmem:[#allocation3 + $0x58] sm:$0xff] %vm226_vm0, %v2902_v60 }
  0x31   : > { %485 = vrot.lane.b32.xlu0 %v411_v40, %s2670_s20  ;;  %v418_v63 = vld [vmem:[#allocation2 + $0xc9] sm:$0xff]  ;;  %381 = vst.msk [vmem:[#allocation3 + $0x60] sm:$0xff] %vm226_vm0, %v2904_v61  ;;  %382 = vst.msk [vmem:[#allocation3 + $0x68] sm:$0xff] %vm226_vm0, %v2906_v62  ;;  %v2918_v2 = vld [vmem:[#allocation2 + $0xc0] sm:$0xff] }
  0x32   : > { %v2914_v0 = vld [vmem:[#allocation2 + $0xa8] sm:$0xff]  ;;  %v2916_v1 = vld [vmem:[#allocation2 + $0xb0] sm:$0xff]  ;;  %385 = vst.msk [vmem:[#allocation3 + $0x80] sm:$0xff] %vm226_vm0, %v2918_v2  ;;  %v2929_v4 = vld [vmem:[#allocation2 + $0xd8] sm:$0xff] }
  0x33   : > { %383 = vst.msk [vmem:[#allocation3 + $0x70] sm:$0xff] %vm226_vm0, %v2914_v0  ;;  %384 = vst.msk [vmem:[#allocation3 + $0x78] sm:$0xff] %vm226_vm0, %v2916_v1  ;;  %v2927_v3 = vld [vmem:[#allocation2 + $0xc8] sm:$0xff]  ;;  %v2931_v5 = vld [vmem:[#allocation2 + $0xe0] sm:$0xff] }
  0x34   : > { %483 = vrot.lane.b32.xlu1 %v410_v41, %s2670_s20  ;;  %386 = vst.msk [vmem:[#allocation3 + $0x88] sm:$0xff] %vm226_vm0, %v2927_v3  ;;  %387 = vst.msk [vmem:[#allocation3 + $0x90] sm:$0xff] %vm226_vm0, %v2929_v4  ;;  %v2939_v6 = vld [vmem:[#allocation2 + $0xf0] sm:$0xff]  ;;  %v2941_v7 = vld [vmem:[#allocation2 + $0xf8] sm:$0xff] }
  0x35   : > { %489 = vrot.lane.b32.xlu0 %v413_v42, %s2670_s20  ;;  %388 = vst.msk [vmem:[#allocation3 + $0x98] sm:$0xff] %vm226_vm0, %v2931_v5  ;;  %v2943_v8 = vld [vmem:[#allocation2 + $0x108] sm:$0xff]  ;;  %389 = vst.msk [vmem:[#allocation3 + $0xa0] sm:$0xff] %vm226_vm0, %v2939_v6  ;;  %v2953_v9 = vld [vmem:[#allocation2 + $0x110] sm:$0xff] }
  0x36   : > { %390 = vst.msk [vmem:[#allocation3 + $0xa8] sm:$0xff] %vm226_vm0, %v2941_v7  ;;  %391 = vst.msk [vmem:[#allocation3 + $0xb0] sm:$0xff] %vm226_vm0, %v2943_v8  ;;  %v2955_v10 = vld [vmem:[#allocation2 + $0xf1] sm:$0xff]  ;;  %v2960_v11 = vld [vmem:[#allocation2 + $0x120] sm:$0xff] }
  0x37   : > { %392 = vst.msk [vmem:[#allocation3 + $0xb8] sm:$0xff] %vm226_vm0, %v2953_v9  ;;  %v2962_v12 = vld [vmem:[#allocation2 + $0x128] sm:$0xff]  ;;  %393 = vst.msk [vmem:[#allocation3 + $0xc0] sm:$0xff] %vm226_vm0, %v2960_v11  ;;  %v2976_v15 = vld [vmem:[#allocation2 + $0x138] sm:$0xff] }
  0x38   : > { %487 = vrot.lane.b32.xlu1 %v412_v43, %s2670_s20  ;;  %v2964_v13 = vld [vmem:[#allocation2 + $0xe1] sm:$0xff]  ;;  %394 = vst.msk [vmem:[#allocation3 + $0xc8] sm:$0xff] %vm226_vm0, %v2962_v12  ;;  %v2972_v14 = vld [vmem:[#allocation2 + $0x109] sm:$0xff]  ;;  %v2980_v17 = vld [vmem:[#allocation2 + $0xf9] sm:$0xff] }
  0x39   : > { %493 = vrot.lane.b32.xlu0 %v415_v44, %s2670_s20  ;;  %v2978_v16 = vld [vmem:[#allocation2 + $0x140] sm:$0xff]  ;;  %395 = vst.msk [vmem:[#allocation3 + $0xd0] sm:$0xff] %vm226_vm0, %v2976_v15  ;;  %v2990_v19 = vld [vmem:[#allocation2 + $0x150] sm:$0xff]  ;;  %v2992_v20 = vld [vmem:[#allocation2 + $0x158] sm:$0xff] }
  0x3a   : > { %396 = vst.msk [vmem:[#allocation3 + $0xd8] sm:$0xff] %vm226_vm0, %v2978_v16  ;;  %v425_v18 = vld [vmem:[#allocation2 + $0x121] sm:$0xff]  ;;  %v2994_v21 = vld [vmem:[#allocation2 + $0x111] sm:$0xff]  ;;  %397 = vst.msk [vmem:[#allocation3 + $0xe0] sm:$0xff] %vm226_vm0, %v2990_v19 }
  0x3b   : > { %398 = vst.msk [vmem:[#allocation3 + $0xe8] sm:$0xff] %vm226_vm0, %v2992_v20  ;;  %v427_v22 = vld [vmem:[#allocation2 + $0x139] sm:$0xff]  ;;  %v3003_v23 = vld [vmem:[#allocation2 + $0x168] sm:$0xff]  ;;  %v3005_v24 = vld [vmem:[#allocation2 + $0x170] sm:$0xff] }
  0x3c   : > { %491 = vrot.lane.b32.xlu1 %v414_v47, %s2670_s20  ;;  %v426_v28 = vld [vmem:[#allocation2 + $0x129] sm:$0xff]  ;;  %399 = vst.msk [vmem:[#allocation3 + $0xf0] sm:$0xff] %vm226_vm0, %v3003_v23  ;;  %400 = vst.msk [vmem:[#allocation3 + $0xf8] sm:$0xff] %vm226_vm0, %v3005_v24  ;;  %v429_v29 = vld [vmem:[#allocation2 + $0x151] sm:$0xff] }
  0x3d   : > { %497 = vrot.lane.b32.xlu0 %v417_v50, %s2670_s20  ;;  %v428_v30 = vld [vmem:[#allocation2 + $0x141] sm:$0xff]  ;;  %v302_v32 = vld [vmem:[%s2772_s19 + $0xf0] sm:$0xff]  ;;  %v303_v34 = vld [vmem:[%s2772_s19 + $0xf8] sm:$0xff] }
  0x3e   : > { %v431_v33 = vld [vmem:[#allocation2 + $0x169] sm:$0xff]  ;;  %335 = vst.msk [vmem:[#allocation2 + $0x181] sm:$0xff] %vm226_vm0, %v302_v32  ;;  %336 = vst.msk [vmem:[#allocation2 + $0x189] sm:$0xff] %vm226_vm0, %v303_v34  ;;  %v430_v35 = vld [vmem:[#allocation2 + $0x159] sm:$0xff] }
  0x3f   : > { %v594_v36 = vld [vmem:[#allocation2 + $0x2] sm:$0xff]  ;;  %v432_v37 = vld [vmem:[#allocation2 + $0x171] sm:$0xff]  ;;  %v3022_v38 = vld [vmem:[#allocation2 + $0x1a] sm:$0xff] }
  0x40   : > { %495 = vrot.lane.b32.xlu1 %v416_v53, %s2670_s20  ;;  %v595_v39 = vld [vmem:[#allocation2 + $0xa] sm:$0xff]  ;;  %v3027_v40 = vld [vmem:[#allocation2 + $0x32] sm:$0xff]  ;;  %v3030_v41 = vld [vmem:[#allocation2 + $0x22] sm:$0xff] }
  0x41   : > { %501 = vrot.lane.b32.xlu0 %v2883_v56, %s2670_s20  ;;  %v3034_v42 = vld [vmem:[#allocation2 + $0x4a] sm:$0xff]  ;;  %v3038_v43 = vld [vmem:[#allocation2 + $0x3a] sm:$0xff]  ;;  %v3042_v44 = vld [vmem:[#allocation2 + $0x62] sm:$0xff] }
  0x42   : > { %v3046_v45 = vld [vmem:[#allocation2 + $0x52] sm:$0xff]  ;;  %v604_v47 = vld [vmem:[#allocation2 + $0x7a] sm:$0xff]  ;;  %v603_v48 = vld [vmem:[#allocation2 + $0x6a] sm:$0xff] }
  0x43   : > { %v606_v50 = vld [vmem:[#allocation2 + $0x92] sm:$0xff]  ;;  %v605_v53 = vld [vmem:[#allocation2 + $0x82] sm:$0xff]  ;;  %v3071_v34 = vld [vmem:[#allocation2 + $0x10a] sm:$0xff] }
  0x44   : > { %499 = vrot.lane.b32.xlu1 %v418_v63, %s2670_s20  ;;  %v608_v63 = vld [vmem:[#allocation2 + $0xaa] sm:$0xff]  ;;  %v3064_v32 = vld [vmem:[#allocation2 + $0xf2] sm:$0xff] }
  0x45   : > { %505 = vrot.lane.b32.xlu0 %v2955_v10, %s2670_s20 }
  0x48   : > { %503 = vrot.lane.b32.xlu1 %v2964_v13, %s2670_s20 }
  0x49   : > { %509 = vrot.lane.b32.xlu0 %v2972_v14, %s2670_s20 }
  0x4c   : > { %507 = vrot.lane.b32.xlu1 %v2980_v17, %s2670_s20 }
  0x4d   : > { %513 = vrot.lane.b32.xlu0 %v425_v18, %s2670_s20  ;;  %v607_v18 = vld [vmem:[#allocation2 + $0x9a] sm:$0xff] }
  0x50   : > { %511 = vrot.lane.b32.xlu1 %v2994_v21, %s2670_s20 }
  0x51   : > { %517 = vrot.lane.b32.xlu0 %v427_v22, %s2670_s20  ;;  %v610_v22 = vld [vmem:[#allocation2 + $0xc2] sm:$0xff] }
  0x54   : > { %515 = vrot.lane.b32.xlu1 %v426_v28, %s2670_s20  ;;  %v609_v28 = vld [vmem:[#allocation2 + $0xb2] sm:$0xff] }
  0x55   : > { %521 = vrot.lane.b32.xlu0 %v429_v29, %s2670_s20  ;;  %v3059_v29 = vld [vmem:[#allocation2 + $0xda] sm:$0xff] }
  0x58   : > { %519 = vrot.lane.b32.xlu1 %v428_v30, %s2670_s20  ;;  %v611_v30 = vld [vmem:[#allocation2 + $0xca] sm:$0xff] }
  0x59   : > { %525 = vrot.lane.b32.xlu0 %v431_v33, %s2670_s20  ;;  %v3067_v33 = vld [vmem:[#allocation2 + $0xe2] sm:$0xff] }
  0x5c   : > { %523 = vrot.lane.b32.xlu1 %v430_v35, %s2670_s20  ;;  %v3075_v35 = vld [vmem:[#allocation2 + $0xfa] sm:$0xff] }
  0x5d   : > { %658 = vrot.lane.b32.xlu0 %v594_v36, %s2671_s21  ;;  %v3079_v36 = vld [vmem:[#allocation2 + $0x122] sm:$0xff] }
  0x60   : > { %527 = vrot.lane.b32.xlu1 %v432_v37, %s2670_s20  ;;  %v3083_v37 = vld [vmem:[#allocation2 + $0x112] sm:$0xff]  ;;  %s3658_s20 = scalar_lea.vmem %s3803_s3, %s2501_s16 }
  0x61   : > { %662 = vrot.lane.b32.xlu0 %v3022_v38, %s2671_s21 }
  0x64   : > { %660 = vrot.lane.b32.xlu1 %v595_v39, %s2671_s21  ;;  %v620_v39 = vld [vmem:[#allocation2 + $0x13a] sm:$0xff] }
  0x65   : > { %666 = vrot.lane.b32.xlu0 %v3027_v40, %s2671_s21 }
  0x68   : > { %664 = vrot.lane.b32.xlu1 %v3030_v41, %s2671_s21 }
  0x69   : > { %670 = vrot.lane.b32.xlu0 %v3034_v42, %s2671_s21 }
  0x6c   : > { %668 = vrot.lane.b32.xlu1 %v3038_v43, %s2671_s21 }
  0x6d   : > { %674 = vrot.lane.b32.xlu0 %v3042_v44, %s2671_s21 }
  0x70   : > { %672 = vrot.lane.b32.xlu1 %v3046_v45, %s2671_s21 }
  0x71   : > { %678 = vrot.lane.b32.xlu0 %v604_v47, %s2671_s21 }
  0x74   : > { %676 = vrot.lane.b32.xlu1 %v603_v48, %s2671_s21  ;;  %v3089_v48 = vld [vmem:[#allocation2 + $0x12a] sm:$0xff] }
  0x75   : > { %682 = vrot.lane.b32.xlu0 %v606_v50, %s2671_s21  ;;  %v622_v50 = vld [vmem:[#allocation2 + $0x152] sm:$0xff] }
  0x78   : > { %680 = vrot.lane.b32.xlu1 %v605_v53, %s2671_s21 }
  0x79   : > { %686 = vrot.lane.b32.xlu0 %v608_v63, %s2671_s21  ;;  %v621_v63 = vld [vmem:[#allocation2 + $0x142] sm:$0xff] }
  0x7c   : > { %684 = vrot.lane.b32.xlu1 %v607_v18, %s2671_s21 }
  0x7d   : > { %690 = vrot.lane.b32.xlu0 %v610_v22, %s2671_s21  ;;  %v624_v22 = vld [vmem:[#allocation2 + $0x16a] sm:$0xff] }
  0x80   : > { %688 = vrot.lane.b32.xlu1 %v609_v28, %s2671_s21 }
  0x81   : > { %694 = vrot.lane.b32.xlu0 %v3059_v29, %s2671_s21  ;;  %v466_v47 = vpop.permute.xlu0 %465 }
  0x82   : > { %562 = vst.msk [vmem:[#allocation3] sm:$0xff] %vm561_vm3, %v466_v47 }
  0x84   : > { %692 = vrot.lane.b32.xlu1 %v611_v30, %s2671_s21  ;;  %v623_v30 = vld [vmem:[#allocation2 + $0x15a] sm:$0xff] }
  0x85   : > { %698 = vrot.lane.b32.xlu0 %v3064_v32, %s2671_s21 }
  0x88   : > { %696 = vrot.lane.b32.xlu1 %v3067_v33, %s2671_s21 }
  0x89   : > { %702 = vrot.lane.b32.xlu0 %v3071_v34, %s2671_s21 }
  0x8c   : > { %700 = vrot.lane.b32.xlu1 %v3075_v35, %s2671_s21 }
  0x8d   : > { %706 = vrot.lane.b32.xlu0 %v3079_v36, %s2671_s21 }
  0x90   : > { %704 = vrot.lane.b32.xlu1 %v3083_v37, %s2671_s21 }
  0x91   : > { %710 = vrot.lane.b32.xlu0 %v620_v39, %s2671_s21 }
  0x93   : > { %v468_v53 = vpop.permute.xlu0 %467 }
  0x94   : > { %708 = vrot.lane.b32.xlu1 %v3089_v48, %s2671_s21  ;;  %563 = vst.msk [vmem:[#allocation3 + $0x8] sm:$0xff] %vm561_vm3, %v468_v53  ;;  %v625_v53 = vld [vmem:[#allocation2 + $0x172] sm:$0xff] }
  0x95   : > { %714 = vrot.lane.b32.xlu0 %v622_v50, %s2671_s21 }
  0x96   : > { %v470_v18 = vpop.permute.xlu1 %469 }
  0x97   : > { %564 = vst.msk [vmem:[#allocation3 + $0x10] sm:$0xff] %vm561_vm3, %v470_v18  ;;  %v474_v28 = vpop.permute.xlu0 %473 }
  0x98   : > { %712 = vrot.lane.b32.xlu1 %v621_v63, %s2671_s21  ;;  %566 = vst.msk [vmem:[#allocation3 + $0x20] sm:$0xff] %vm561_vm3, %v474_v28 }
  0x99   : > { %718 = vrot.lane.b32.xlu0 %v624_v22, %s2671_s21 }
  0x9a   : > { %v472_v39 = vpop.permute.xlu1 %471 }
  0x9b   : > { %565 = vst.msk [vmem:[#allocation3 + $0x18] sm:$0xff] %vm561_vm3, %v472_v39  ;;  %v478_v47 = vpop.permute.xlu0 %477 }
  0x9c   : > { %716 = vrot.lane.b32.xlu1 %v623_v30, %s2671_s21  ;;  %568 = vst.msk [vmem:[#allocation3 + $0x30] sm:$0xff] %vm561_vm3, %v478_v47 }
  0x9d   : > { %851 = vrot.lane.b32.xlu0 %v2859_v46, %s2672_s22 }
  0x9e   : > { %v476_v50 = vpop.permute.xlu1 %475 }
  0x9f   : > { %567 = vst.msk [vmem:[#allocation3 + $0x28] sm:$0xff] %vm561_vm3, %v476_v50  ;;  %v482_v63 = vpop.permute.xlu0 %481 }
  0xa0   : > { %720 = vrot.lane.b32.xlu1 %v625_v53, %s2671_s21  ;;  %570 = vst.msk [vmem:[#allocation3 + $0x40] sm:$0xff] %vm561_vm3, %v482_v63 }
  0xa1   : > { %855 = vrot.lane.b32.xlu0 %v2870_v51, %s2672_s22 }
  0xa2   : > { %v480_v18 = vpop.permute.xlu1 %479 }
  0xa3   : > { %569 = vst.msk [vmem:[#allocation3 + $0x38] sm:$0xff] %vm561_vm3, %v480_v18  ;;  %v486_v22 = vpop.permute.xlu0 %485 }
  0xa4   : > { %853 = vrot.lane.b32.xlu1 %v2866_v49, %s2672_s22  ;;  %572 = vst.msk [vmem:[#allocation3 + $0x50] sm:$0xff] %vm561_vm3, %v486_v22 }
  0xa5   : > { %859 = vrot.lane.b32.xlu0 %v2879_v54, %s2672_s22 }
  0xa6   : > { %v484_v46 = vpop.permute.xlu1 %483 }
  0xa7   : > { %571 = vst.msk [vmem:[#allocation3 + $0x48] sm:$0xff] %vm561_vm3, %v484_v46  ;;  %v490_v28 = vpop.permute.xlu0 %489 }
  0xa8   : > { %857 = vrot.lane.b32.xlu1 %v2872_v52, %s2672_s22  ;;  %574 = vst.msk [vmem:[#allocation3 + $0x60] sm:$0xff] %vm561_vm3, %v490_v28 }
  0xa9   : > { %863 = vrot.lane.b32.xlu0 %v2889_v57, %s2672_s22 }
  0xaa   : > { %v488_v30 = vpop.permute.xlu1 %487 }
  0xab   : > { %573 = vst.msk [vmem:[#allocation3 + $0x58] sm:$0xff] %vm561_vm3, %v488_v30  ;;  %v494_v49 = vpop.permute.xlu0 %493 }
  0xac   : > { %861 = vrot.lane.b32.xlu1 %v2881_v55, %s2672_s22  ;;  %576 = vst.msk [vmem:[#allocation3 + $0x70] sm:$0xff] %vm561_vm3, %v494_v49 }
  0xad   : > { %867 = vrot.lane.b32.xlu0 %v2893_v59, %s2672_s22 }
  0xae   : > { %v492_v39 = vpop.permute.xlu1 %491 }
  0xaf   : > { %575 = vst.msk [vmem:[#allocation3 + $0x68] sm:$0xff] %vm561_vm3, %v492_v39  ;;  %v498_v47 = vpop.permute.xlu0 %497 }
  0xb0   : > { %865 = vrot.lane.b32.xlu1 %v2891_v58, %s2672_s22  ;;  %578 = vst.msk [vmem:[#allocation3 + $0x80] sm:$0xff] %vm561_vm3, %v498_v47 }
  0xb1   : > { %871 = vrot.lane.b32.xlu0 %v2904_v61, %s2672_s22 }
  0xb2   : > { %v496_v53 = vpop.permute.xlu1 %495 }
  0xb3   : > { %577 = vst.msk [vmem:[#allocation3 + $0x78] sm:$0xff] %vm561_vm3, %v496_v53  ;;  %v502_v50 = vpop.permute.xlu0 %501  ;;  %v817_v53 = vld [vmem:[#allocation2 + $0x180] sm:$0xff] }
  0xb4   : > { %869 = vrot.lane.b32.xlu1 %v2902_v60, %s2672_s22  ;;  %580 = vst.msk [vmem:[#allocation3 + $0x90] sm:$0xff] %vm561_vm3, %v502_v50 }
  0xb5   : > { %875 = vrot.lane.b32.xlu0 %v2914_v0, %s2672_s22 }
  0xb6   : > { %v500_v63 = vpop.permute.xlu1 %499 }
  0xb7   : > { %579 = vst.msk [vmem:[#allocation3 + $0x88] sm:$0xff] %vm561_vm3, %v500_v63  ;;  %v506_v18 = vpop.permute.xlu0 %505 }
  0xb8   : > { %873 = vrot.lane.b32.xlu1 %v2906_v62, %s2672_s22  ;;  %582 = vst.msk [vmem:[#allocation3 + $0xa0] sm:$0xff] %vm561_vm3, %v506_v18 }
  0xb9   : > { %879 = vrot.lane.b32.xlu0 %v2918_v2, %s2672_s22 }
  0xba   : > { %v504_v61 = vpop.permute.xlu1 %503 }
  0xbb   : > { %581 = vst.msk [vmem:[#allocation3 + $0x98] sm:$0xff] %vm561_vm3, %v504_v61  ;;  %v510_v22 = vpop.permute.xlu0 %509  ;;  %v818_v61 = vld [vmem:[#allocation2 + $0x188] sm:$0xff] }
  0xbc   : > { %877 = vrot.lane.b32.xlu1 %v2916_v1, %s2672_s22  ;;  %584 = vst.msk [vmem:[#allocation3 + $0xb0] sm:$0xff] %vm561_vm3, %v510_v22 }
  0xbd   : > { %883 = vrot.lane.b32.xlu0 %v2929_v4, %s2672_s22 }
  0xbe   : > { %v508_v0 = vpop.permute.xlu1 %507 }
  0xbf   : > { %583 = vst.msk [vmem:[#allocation3 + $0xa8] sm:$0xff] %vm561_vm3, %v508_v0  ;;  %v514_v62 = vpop.permute.xlu0 %513 }
  0xc0   : > { %881 = vrot.lane.b32.xlu1 %v2927_v3, %s2672_s22  ;;  %586 = vst.msk [vmem:[#allocation3 + $0xc0] sm:$0xff] %vm561_vm3, %v514_v62 }
  0xc1   : > { %887 = vrot.lane.b32.xlu0 %v2939_v6, %s2672_s22 }
  0xc2   : > { %v512_v2 = vpop.permute.xlu1 %511 }
  0xc3   : > { %585 = vst.msk [vmem:[#allocation3 + $0xb8] sm:$0xff] %vm561_vm3, %v512_v2  ;;  %v518_v1 = vpop.permute.xlu0 %517 }
  0xc4   : > { %885 = vrot.lane.b32.xlu1 %v2931_v5, %s2672_s22  ;;  %588 = vst.msk [vmem:[#allocation3 + $0xd0] sm:$0xff] %vm561_vm3, %v518_v1  ;;  %v1978_v1 = vld [vmem:[%s3801_s1] sm:$0xff] }
  0xc5   : > { %891 = vrot.lane.b32.xlu0 %v2943_v8, %s2672_s22 }
  0xc6   : > { %v516_v4 = vpop.permute.xlu1 %515 }
  0xc7   : > { %587 = vst.msk [vmem:[#allocation3 + $0xc8] sm:$0xff] %vm561_vm3, %v516_v4  ;;  %v522_v3 = vpop.permute.xlu0 %521 }
  0xc8   : > { %889 = vrot.lane.b32.xlu1 %v2941_v7, %s2672_s22  ;;  %590 = vst.msk [vmem:[#allocation3 + $0xe0] sm:$0xff] %vm561_vm3, %v522_v3 }
  0xc9   : > { %895 = vrot.lane.b32.xlu0 %v2960_v11, %s2672_s22 }
  0xca   : > { %v520_v46 = vpop.permute.xlu1 %519 }
  0xcb   : > { %589 = vst.msk [vmem:[#allocation3 + $0xd8] sm:$0xff] %vm561_vm3, %v520_v46  ;;  %v526_v5 = vpop.permute.xlu0 %525  ;;  %v1980_v46 = vld [vmem:[%s3801_s1 + $0x10] sm:$0xff] }
  0xcc   : > { %893 = vrot.lane.b32.xlu1 %v2953_v9, %s2672_s22  ;;  %592 = vst.msk [vmem:[#allocation3 + $0xf0] sm:$0xff] %vm561_vm3, %v526_v5  ;;  %v1981_v5 = vld [vmem:[%s3801_s1 + $0x18] sm:$0xff] }
  0xcd   : > { %899 = vrot.lane.b32.xlu0 %v2976_v15, %s2672_s22 }
  0xce   : > { %v524_v28 = vpop.permute.xlu1 %523 }
  0xcf   : > { %591 = vst.msk [vmem:[#allocation3 + $0xe8] sm:$0xff] %vm561_vm3, %v524_v28  ;;  %v659_v30 = vpop.permute.xlu0 %658 }
  0xd0   : > { %897 = vrot.lane.b32.xlu1 %v2962_v12, %s2672_s22  ;;  %755 = vst.msk [vmem:[#allocation3] sm:$0xff] %vm754_vm4, %v659_v30  ;;  %v2602_v30 = vpack.c.bf16 %v1981_v5, %v1980_v46 }
  0xd1   : > { %903 = vrot.lane.b32.xlu0 %v2990_v19, %s2672_s22 }
  0xd2   : > { %v528_v49 = vpop.permute.xlu1 %527 }
  0xd3   : > { %593 = vst.msk [vmem:[#allocation3 + $0xf8] sm:$0xff] %vm561_vm3, %v528_v49  ;;  %v663_v39 = vpop.permute.xlu0 %662 }
  0xd4   : > { %901 = vrot.lane.b32.xlu1 %v2978_v16, %s2672_s22  ;;  %757 = vst.msk [vmem:[#allocation3 + $0x10] sm:$0xff] %vm754_vm4, %v663_v39 }
  0xd5   : > { %907 = vrot.lane.b32.xlu0 %v3003_v23, %s2672_s22 }
  0xd6   : > { %v661_v47 = vpop.permute.xlu1 %660 }
  0xd7   : > { %756 = vst.msk [vmem:[#allocation3 + $0x8] sm:$0xff] %vm754_vm4, %v661_v47  ;;  %v667_v50 = vpop.permute.xlu0 %666 }
  0xd8   : > { %905 = vrot.lane.b32.xlu1 %v2992_v20, %s2672_s22  ;;  %759 = vst.msk [vmem:[#allocation3 + $0x20] sm:$0xff] %vm754_vm4, %v667_v50 }
  0xd9   : > { %911 = vrot.lane.b32.xlu0 %v817_v53, %s2672_s22 }
  0xda   : > { %v665_v63 = vpop.permute.xlu1 %664 }
  0xdb   : > { %758 = vst.msk [vmem:[#allocation3 + $0x18] sm:$0xff] %vm754_vm4, %v665_v63  ;;  %v671_v18 = vpop.permute.xlu0 %670 }
  0xdc   : > { %909 = vrot.lane.b32.xlu1 %v3005_v24, %s2672_s22  ;;  %761 = vst.msk [vmem:[#allocation3 + $0x30] sm:$0xff] %vm754_vm4, %v671_v18  ;;  %v1562_v18 = vld [vmem:[#allocation2 + $0x49] sm:$0xff] }
  0xdd   : > { %1044 = vrot.lane.b32.xlu0 %v2817_v25, %s2673_s23 }
  0xde   : > { %v669_v23 = vpop.permute.xlu1 %668 }
  0xdf   : > { %760 = vst.msk [vmem:[#allocation3 + $0x28] sm:$0xff] %vm754_vm4, %v669_v23  ;;  %v675_v22 = vpop.permute.xlu0 %674 }
  0xe0   : > { %913 = vrot.lane.b32.xlu1 %v818_v61, %s2672_s22  ;;  %763 = vst.msk [vmem:[#allocation3 + $0x40] sm:$0xff] %vm754_vm4, %v675_v22 }
  0xe1   : > { %1048 = vrot.lane.b32.xlu0 %v2819_v26, %s2673_s23 }
  0xe2   : > { %v673_v0 = vpop.permute.xlu1 %672 }
  0xe3   : > { %762 = vst.msk [vmem:[#allocation3 + $0x38] sm:$0xff] %vm754_vm4, %v673_v0  ;;  %v679_v24 = vpop.permute.xlu0 %678 }
  0xe4   : > { %1046 = vrot.lane.b32.xlu1 %v2826_v27, %s2673_s23  ;;  %765 = vst.msk [vmem:[#allocation3 + $0x50] sm:$0xff] %vm754_vm4, %v679_v24 }
  0xe5   : > { %1078 = vrot.lane.b32.xlu0 %v2964_v13, %s2673_s23 }
  0xe6   : > { %v677_v25 = vpop.permute.xlu1 %676 }
  0xe7   : > { %764 = vst.msk [vmem:[#allocation3 + $0x48] sm:$0xff] %vm754_vm4, %v677_v25  ;;  %v683_v62 = vpop.permute.xlu0 %682 }
  0xe8   : > { %1076 = vrot.lane.b32.xlu1 %v2883_v56, %s2673_s23  ;;  %767 = vst.msk [vmem:[#allocation3 + $0x60] sm:$0xff] %vm754_vm4, %v683_v62 }
  0xe9   : > { %1269 = vrot.lane.b32.xlu0 %v3059_v29, %s2674_s24 }
  0xea   : > { %v681_v2 = vpop.permute.xlu1 %680 }
  0xeb   : > { %766 = vst.msk [vmem:[#allocation3 + $0x58] sm:$0xff] %vm754_vm4, %v681_v2  ;;  %v687_v27 = vpop.permute.xlu0 %686 }
  0xec   : > { %1237 = vrot.lane.b32.xlu1 %v3022_v38, %s2674_s24  ;;  %769 = vst.msk [vmem:[#allocation3 + $0x70] sm:$0xff] %vm754_vm4, %v687_v27 }
  0xed   : > { %1271 = vrot.lane.b32.xlu0 %v3067_v33, %s2674_s24 }
  0xee   : > { %v685_v13 = vpop.permute.xlu1 %684 }
  0xef   : > { %768 = vst.msk [vmem:[#allocation3 + $0x68] sm:$0xff] %vm754_vm4, %v685_v13  ;;  %v691_v56 = vpop.permute.xlu0 %690 }
  0xf0   : > { %1239 = vrot.lane.b32.xlu1 %v3030_v41, %s2674_s24  ;;  %771 = vst.msk [vmem:[#allocation3 + $0x80] sm:$0xff] %vm754_vm4, %v691_v56 }
  0xf1   : > { %1463 = vrot.lane.b32.xlu0 %v2939_v6, %s2675_s25 }
  0xf2   : > { %v689_v29 = vpop.permute.xlu1 %688 }
  0xf3   : > { %770 = vst.msk [vmem:[#allocation3 + $0x78] sm:$0xff] %vm754_vm4, %v689_v29  ;;  %v695_v38 = vpop.permute.xlu0 %694  ;;  %v1564_v29 = vld [vmem:[#allocation2 + $0x61] sm:$0xff] }
  0xf4   : > { %1431 = vrot.lane.b32.xlu1 %v2870_v51, %s2675_s25  ;;  %773 = vst.msk [vmem:[#allocation3 + $0x90] sm:$0xff] %vm754_vm4, %v695_v38 }
  0xf5   : > { %1465 = vrot.lane.b32.xlu0 %v2941_v7, %s2675_s25 }
  0xf6   : > { %v693_v33 = vpop.permute.xlu1 %692 }
  0xf7   : > { %772 = vst.msk [vmem:[#allocation3 + $0x88] sm:$0xff] %vm754_vm4, %v693_v33  ;;  %v699_v41 = vpop.permute.xlu0 %698  ;;  %v1580_v33 = vld [vmem:[#allocation2 + $0x121] sm:$0xff] }
  0xf8   : > { %1433 = vrot.lane.b32.xlu1 %v2872_v52, %s2675_s25  ;;  %775 = vst.msk [vmem:[#allocation3 + $0xa0] sm:$0xff] %vm754_vm4, %v699_v41 }
  0xf9   : > { %1656 = vrot.lane.b32.xlu0 %v2955_v10, %s2676_s26 }
  0xfa   : > { %v697_v6 = vpop.permute.xlu1 %696 }
  0xfb   : > { %774 = vst.msk [vmem:[#allocation3 + $0x98] sm:$0xff] %vm754_vm4, %v697_v6  ;;  %v703_v51 = vpop.permute.xlu0 %702 }
  0xfc   : > { %1624 = vrot.lane.b32.xlu1 %v2819_v26, %s2676_s26  ;;  %777 = vst.msk [vmem:[#allocation3 + $0xb0] sm:$0xff] %vm754_vm4, %v703_v51  ;;  %v1979_v26 = vld [vmem:[%s3801_s1 + $0x8] sm:$0xff] }
  0xfd   : > { %1626 = vrot.lane.b32.xlu0 %v2836_v31, %s2676_s26  ;;  %v2598_v3 = vpack.c.bf16 %v1979_v26, %v1978_v1  ;;  %v1581_v51 = vld [vmem:[#allocation2 + $0x129] sm:$0xff] }
  0xfe   : > { %v701_v7 = vpop.permute.xlu1 %700  ;;  %v1179_v26 = vld [vmem:[#allocation2 + $0x62] sm:$0xff] }
  0xff   : > { %776 = vst.msk [vmem:[#allocation3 + $0xa8] sm:$0xff] %vm754_vm4, %v701_v7  ;;  %v707_v52 = vpop.permute.xlu0 %706  ;;  %2599 = vmatprep.subr.bf16.mxu0 %v2598_v3  ;;  %2606 = vmatprep.subr.bf16.mxu1 %v2598_v3 }
 0x100   : > { %1080 = vrot.lane.b32.xlu1 %v2955_v10, %s2673_s23  ;;  %779 = vst.msk [vmem:[#allocation3 + $0xc0] sm:$0xff] %vm754_vm4, %v707_v52  ;;  %2601 = vmatpush3.bf16.msra.mxu0 %v2598_v3 }
 0x101   : > { %1817 = vrot.lane.b32.xlu0 %v3027_v40, %s2677_s4  ;;  %2609 = vmatpush3.bf16.msra.mxu1 %v2598_v3  ;;  %v1758_v3 = vld [vmem:[#allocation2 + $0x6a] sm:$0xff] }
 0x102   : > { %v705_v4 = vpop.permute.xlu1 %704  ;;  %2603 = vmatprep.subr.bf16.mxu0 %v2602_v30  ;;  %2607 = vmatprep.subr.bf16.mxu1 %v2602_v30 }
 0x103   : > { %778 = vst.msk [vmem:[#allocation3 + $0xb8] sm:$0xff] %vm754_vm4, %v705_v4  ;;  %v711_v10 = vpop.permute.xlu0 %710 }
 0x104   : > { %1658 = vrot.lane.b32.xlu1 %v2980_v17, %s2676_s26  ;;  %781 = vst.msk [vmem:[#allocation3 + $0xd0] sm:$0xff] %vm754_vm4, %v711_v10  ;;  %2605 = vmatpush3.bf16.msra.mxu0 %v2602_v30 }
 0x105   : > { %1050 = vrot.lane.b32.xlu0 %v2836_v31, %s2673_s23  ;;  %2610 = vmatpush3.bf16.msra.mxu1 %v2602_v30  ;;  %v1982_v31 = vld [vmem:[%s3801_s1 + $0x20] sm:$0xf] }
 0x106   : > { %v709_v28 = vpop.permute.xlu1 %708  ;;  %2548 = vmatprep.subr.msk.mxu0 %vm2087_vm5, %v1982_v31  ;;  %2608 = vmatprep.subr.msk.mxu1 %vm2087_vm5, %v1982_v31 }
 0x107   : > { %780 = vst.msk [vmem:[#allocation3 + $0xc8] sm:$0xff] %vm754_vm4, %v709_v28  ;;  %v715_v49 = vpop.permute.xlu0 %714 }
 0x108   : > { %1849 = vrot.lane.b32.xlu1 %v3064_v32, %s2677_s4  ;;  %783 = vst.msk [vmem:[#allocation3 + $0xe0] sm:$0xff] %vm754_vm4, %v715_v49  ;;  %2549 = vmatpush3.msk.msra.mxu0 %vm2087_vm5, %v1982_v31 }
 0x109   : > { %1241 = vrot.lane.b32.xlu0 %v3027_v40, %s2674_s24  ;;  %2611 = vmatpush3.msk.msra.mxu1 %vm2087_vm5, %v1982_v31  ;;  %v1566_v31 = vld [vmem:[#allocation2 + $0x79] sm:$0xff] }
 0x10a   : > { %v713_v39 = vpop.permute.xlu1 %712 }
 0x10b   : > { %782 = vst.msk [vmem:[#allocation3 + $0xd8] sm:$0xff] %vm754_vm4, %v713_v39  ;;  %v719_v47 = vpop.permute.xlu0 %718 }
 0x10c   : > { %1082 = vrot.lane.b32.xlu1 %v2980_v17, %s2673_s23  ;;  %785 = vst.msk [vmem:[#allocation3 + $0xf0] sm:$0xff] %vm754_vm4, %v719_v47 }
 0x10d   : > { %1819 = vrot.lane.b32.xlu0 %v3038_v43, %s2677_s4 }
 0x10e   : > { %v717_v53 = vpop.permute.xlu1 %716 }
 0x10f   : > { %784 = vst.msk [vmem:[#allocation3 + $0xe8] sm:$0xff] %vm754_vm4, %v717_v53  ;;  %v852_v40 = vpop.permute.xlu0 %851 }
 0x110   : > { %1273 = vrot.lane.b32.xlu1 %v3064_v32, %s2674_s24  ;;  %948 = vst.msk [vmem:[#allocation3] sm:$0xff] %vm947_vm6, %v852_v40 }
 0x111   : > { %1243 = vrot.lane.b32.xlu0 %v3038_v43, %s2674_s24 }
 0x112   : > { %v721_v17 = vpop.permute.xlu1 %720 }
 0x113   : > { %786 = vst.msk [vmem:[#allocation3 + $0xf8] sm:$0xff] %vm754_vm4, %v721_v17  ;;  %v856_v50 = vpop.permute.xlu0 %855 }
 0x114   : > { %1851 = vrot.lane.b32.xlu1 %v3075_v35, %s2677_s4  ;;  %950 = vst.msk [vmem:[#allocation3 + $0x10] sm:$0xff] %vm947_vm6, %v856_v50 }
 0x115   : > { %1435 = vrot.lane.b32.xlu0 %v2879_v54, %s2675_s25 }
 0x116   : > { %v854_v63 = vpop.permute.xlu1 %853 }
 0x117   : > { %949 = vst.msk [vmem:[#allocation3 + $0x8] sm:$0xff] %vm947_vm6, %v854_v63  ;;  %v860_v32 = vpop.permute.xlu0 %859  ;;  %v1583_v63 = vld [vmem:[#allocation2 + $0x141] sm:$0xff] }
 0x118   : > { %1275 = vrot.lane.b32.xlu1 %v3075_v35, %s2674_s24  ;;  %952 = vst.msk [vmem:[#allocation3 + $0x20] sm:$0xff] %vm947_vm6, %v860_v32 }
 0x119   : > { %1437 = vrot.lane.b32.xlu0 %v2881_v55, %s2675_s25 }
 0x11a   : > { %v858_v43 = vpop.permute.xlu1 %857 }
 0x11b   : > { %951 = vst.msk [vmem:[#allocation3 + $0x18] sm:$0xff] %vm947_vm6, %v858_v43  ;;  %v864_v61 = vpop.permute.xlu0 %863 }
 0x11c   : > { %1467 = vrot.lane.b32.xlu1 %v2943_v8, %s2675_s25  ;;  %954 = vst.msk [vmem:[#allocation3 + $0x30] sm:$0xff] %vm947_vm6, %v864_v61  ;;  %v1563_v8 = vld [vmem:[#allocation2 + $0x51] sm:$0xff]  ;;  %v1775_v61 = vld [vmem:[#allocation2 + $0x13a] sm:$0xff] }
 0x11d   : > { %1628 = vrot.lane.b32.xlu0 %v1562_v18, %s2676_s26 }
 0x11e   : > { %v862_v54 = vpop.permute.xlu1 %861 }
 0x11f   : > { %953 = vst.msk [vmem:[#allocation3 + $0x28] sm:$0xff] %vm947_vm6, %v862_v54  ;;  %v868_v35 = vpop.permute.xlu0 %867 }
 0x120   : > { %1469 = vrot.lane.b32.xlu1 %v2953_v9, %s2675_s25  ;;  %956 = vst.msk [vmem:[#allocation3 + $0x40] sm:$0xff] %vm947_vm6, %v868_v35 }
 0x121   : > { %1052 = vrot.lane.b32.xlu0 %v1562_v18, %s2673_s23 }
 0x122   : > { %v866_v55 = vpop.permute.xlu1 %865 }
 0x123   : > { %955 = vst.msk [vmem:[#allocation3 + $0x38] sm:$0xff] %vm947_vm6, %v866_v55  ;;  %v872_v23 = vpop.permute.xlu0 %871 }
 0x124   : > { %1660 = vrot.lane.b32.xlu1 %v2972_v14, %s2676_s26  ;;  %958 = vst.msk [vmem:[#allocation3 + $0x50] sm:$0xff] %vm947_vm6, %v872_v23  ;;  %v1760_v23 = vld [vmem:[#allocation2 + $0x82] sm:$0xff] }
 0x125   : > { %1630 = vrot.lane.b32.xlu0 %v1563_v8, %s2676_s26 }
 0x126   : > { %v870_v22 = vpop.permute.xlu1 %869 }
 0x127   : > { %957 = vst.msk [vmem:[#allocation3 + $0x48] sm:$0xff] %vm947_vm6, %v870_v22  ;;  %v876_v9 = vpop.permute.xlu0 %875 }
 0x128   : > { %1084 = vrot.lane.b32.xlu1 %v2972_v14, %s2673_s23  ;;  %960 = vst.msk [vmem:[#allocation3 + $0x60] sm:$0xff] %vm947_vm6, %v876_v9 }
 0x129   : > { %1821 = vrot.lane.b32.xlu0 %v3034_v42, %s2677_s4 }
 0x12a   : > { %v874_v0 = vpop.permute.xlu1 %873 }
 0x12b   : > { %959 = vst.msk [vmem:[#allocation3 + $0x58] sm:$0xff] %vm947_vm6, %v874_v0  ;;  %v880_v24 = vpop.permute.xlu0 %879 }
 0x12c   : > { %1662 = vrot.lane.b32.xlu1 %v2994_v21, %s2676_s26  ;;  %962 = vst.msk [vmem:[#allocation3 + $0x70] sm:$0xff] %vm947_vm6, %v880_v24 }
 0x12d   : > { %1054 = vrot.lane.b32.xlu0 %v1563_v8, %s2673_s23 }
 0x12e   : > { %v878_v25 = vpop.permute.xlu1 %877 }
 0x12f   : > { %961 = vst.msk [vmem:[#allocation3 + $0x68] sm:$0xff] %vm947_vm6, %v878_v25  ;;  %v884_v14 = vpop.permute.xlu0 %883  ;;  %v1776_v25 = vld [vmem:[#allocation2 + $0x142] sm:$0xff] }
 0x130   : > { %1853 = vrot.lane.b32.xlu1 %v3071_v34, %s2677_s4  ;;  %964 = vst.msk [vmem:[#allocation3 + $0x80] sm:$0xff] %vm947_vm6, %v884_v14 }
 0x131   : > { %1245 = vrot.lane.b32.xlu0 %v3034_v42, %s2674_s24 }
 0x132   : > { %v882_v62 = vpop.permute.xlu1 %881 }
 0x133   : > { %963 = vst.msk [vmem:[#allocation3 + $0x78] sm:$0xff] %vm947_vm6, %v882_v62  ;;  %v888_v2 = vpop.permute.xlu0 %887  ;;  %v1375_v62 = vld [vmem:[#allocation2 + $0x90] sm:$0xff] }
 0x134   : > { %1086 = vrot.lane.b32.xlu1 %v2994_v21, %s2673_s23  ;;  %966 = vst.msk [vmem:[#allocation3 + $0x90] sm:$0xff] %vm947_vm6, %v888_v2 }
 0x135   : > { %1823 = vrot.lane.b32.xlu0 %v3046_v45, %s2677_s4 }
 0x136   : > { %v886_v27 = vpop.permute.xlu1 %885 }
 0x137   : > { %965 = vst.msk [vmem:[#allocation3 + $0x88] sm:$0xff] %vm947_vm6, %v886_v27  ;;  %v892_v13 = vpop.permute.xlu0 %891 }
 0x138   : > { %1277 = vrot.lane.b32.xlu1 %v3071_v34, %s2674_s24  ;;  %968 = vst.msk [vmem:[#allocation3 + $0xa0] sm:$0xff] %vm947_vm6, %v892_v13 }
 0x139   : > { %1247 = vrot.lane.b32.xlu0 %v3046_v45, %s2674_s24 }
 0x13a   : > { %v890_v42 = vpop.permute.xlu1 %889 }
 0x13b   : > { %967 = vst.msk [vmem:[#allocation3 + $0x98] sm:$0xff] %vm947_vm6, %v890_v42  ;;  %v896_v21 = vpop.permute.xlu0 %895  ;;  %v1376_v42 = vld [vmem:[#allocation2 + $0x98] sm:$0xff] }
 0x13c   : > { %1855 = vrot.lane.b32.xlu1 %v3083_v37, %s2677_s4  ;;  %970 = vst.msk [vmem:[#allocation3 + $0xb0] sm:$0xff] %vm947_vm6, %v896_v21 }
 0x13d   : > { %1439 = vrot.lane.b32.xlu0 %v2889_v57, %s2675_s25 }
 0x13e   : > { %v894_v56 = vpop.permute.xlu1 %893 }
 0x13f   : > { %969 = vst.msk [vmem:[#allocation3 + $0xa8] sm:$0xff] %vm947_vm6, %v894_v56  ;;  %v900_v34 = vpop.permute.xlu0 %899 }
 0x140   : > { %1279 = vrot.lane.b32.xlu1 %v3083_v37, %s2674_s24  ;;  %972 = vst.msk [vmem:[#allocation3 + $0xc0] sm:$0xff] %vm947_vm6, %v900_v34  ;;  %v1568_v34 = vld [vmem:[#allocation2 + $0x91] sm:$0xff] }
 0x141   : > { %1441 = vrot.lane.b32.xlu0 %v2891_v58, %s2675_s25 }
 0x142   : > { %v898_v45 = vpop.permute.xlu1 %897 }
 0x143   : > { %971 = vst.msk [vmem:[#allocation3 + $0xb8] sm:$0xff] %vm947_vm6, %v898_v45  ;;  %v904_v38 = vpop.permute.xlu0 %903 }
 0x144   : > { %1471 = vrot.lane.b32.xlu1 %v2960_v11, %s2675_s25  ;;  %974 = vst.msk [vmem:[#allocation3 + $0xd0] sm:$0xff] %vm947_vm6, %v904_v38  ;;  %v1565_v11 = vld [vmem:[#allocation2 + $0x69] sm:$0xff] }
 0x145   : > { %1632 = vrot.lane.b32.xlu0 %v1564_v29, %s2676_s26 }
 0x146   : > { %v902_v57 = vpop.permute.xlu1 %901 }
 0x147   : > { %973 = vst.msk [vmem:[#allocation3 + $0xc8] sm:$0xff] %vm947_vm6, %v902_v57  ;;  %v908_v37 = vpop.permute.xlu0 %907  ;;  %v1584_v57 = vld [vmem:[#allocation2 + $0x151] sm:$0xff] }
 0x148   : > { %1473 = vrot.lane.b32.xlu1 %v2962_v12, %s2675_s25  ;;  %976 = vst.msk [vmem:[#allocation3 + $0xe0] sm:$0xff] %vm947_vm6, %v908_v37 }
 0x149   : > { %1056 = vrot.lane.b32.xlu0 %v1564_v29, %s2673_s23 }
 0x14a   : > { %v906_v58 = vpop.permute.xlu1 %905 }
 0x14b   : > { %975 = vst.msk [vmem:[#allocation3 + $0xd8] sm:$0xff] %vm947_vm6, %v906_v58  ;;  %v912_v41 = vpop.permute.xlu0 %911 }
 0x14c   : > { %1664 = vrot.lane.b32.xlu1 %v1580_v33, %s2676_s26  ;;  %978 = vst.msk [vmem:[#allocation3 + $0xf0] sm:$0xff] %vm947_vm6, %v912_v41  ;;  %v1585_v41 = vld [vmem:[#allocation2 + $0x159] sm:$0xff] }
 0x14d   : > { %1634 = vrot.lane.b32.xlu0 %v1565_v11, %s2676_s26 }
 0x14e   : > { %v910_v6 = vpop.permute.xlu1 %909 }
 0x14f   : > { %977 = vst.msk [vmem:[#allocation3 + $0xe8] sm:$0xff] %vm947_vm6, %v910_v6  ;;  %v1045_v12 = vpop.permute.xlu0 %1044 }
 0x150   : > { %1088 = vrot.lane.b32.xlu1 %v1580_v33, %s2673_s23  ;;  %1141 = vst.msk [vmem:[#allocation3] sm:$0xff] %vm1140_vm7, %v1045_v12 }
 0x151   : > { %1825 = vrot.lane.b32.xlu0 %v3042_v44, %s2677_s4 }
 0x152   : > { %v914_v7 = vpop.permute.xlu1 %913 }
 0x153   : > { %979 = vst.msk [vmem:[#allocation3 + $0xf8] sm:$0xff] %vm947_vm6, %v914_v7  ;;  %v1049_v52 = vpop.permute.xlu0 %1048  ;;  %v1777_v7 = vld [vmem:[#allocation2 + $0x152] sm:$0xff] }
 0x154   : > { %1666 = vrot.lane.b32.xlu1 %v1581_v51, %s2676_s26  ;;  %1143 = vst.msk [vmem:[#allocation3 + $0x10] sm:$0xff] %vm1140_vm7, %v1049_v52 }
 0x155   : > { %1058 = vrot.lane.b32.xlu0 %v1565_v11, %s2673_s23 }
 0x156   : > { %v1047_v1 = vpop.permute.xlu1 %1046 }
 0x157   : > { %1142 = vst.msk [vmem:[#allocation3 + $0x8] sm:$0xff] %vm1140_vm7, %v1047_v1  ;;  %v1079_v4 = vpop.permute.xlu0 %1078 }
 0x158   : > { %1857 = vrot.lane.b32.xlu1 %v3079_v36, %s2677_s4  ;;  %1158 = vst.msk [vmem:[#allocation3 + $0x88] sm:$0xff] %vm1140_vm7, %v1079_v4 }
 0x159   : > { %1249 = vrot.lane.b32.xlu0 %v1179_v26, %s2674_s24 }
 0x15a   : > { %v1077_v44 = vpop.permute.xlu1 %1076 }
 0x15b   : > { %1157 = vst.msk [vmem:[#allocation3 + $0x80] sm:$0xff] %vm1140_vm7, %v1077_v44  ;;  %v1270_v10 = vpop.permute.xlu0 %1269  ;;  %v1762_v44 = vld [vmem:[#allocation2 + $0x9a] sm:$0xff] }
 0x15c   : > { %1090 = vrot.lane.b32.xlu1 %v1581_v51, %s2673_s23  ;;  %1350 = vst.msk [vmem:[#allocation3 + $0x80] sm:$0xff] %vm1333_vm8, %v1270_v10 }
 0x15d   : > { %1827 = vrot.lane.b32.xlu0 %v1758_v3, %s2677_s4 }
 0x15e   : > { %v1238_v46 = vpop.permute.xlu1 %1237 }
 0x15f   : > { %1334 = vst.msk [vmem:[#allocation3] sm:$0xff] %vm1333_vm8, %v1238_v46  ;;  %v1272_v5 = vpop.permute.xlu0 %1271 }
 0x160   : > { %1281 = vrot.lane.b32.xlu1 %v3079_v36, %s2674_s24  ;;  %1351 = vst.msk [vmem:[#allocation3 + $0x88] sm:$0xff] %vm1333_vm8, %v1272_v5 }
 0x161   : > { %1251 = vrot.lane.b32.xlu0 %v1758_v3, %s2674_s24 }
 0x162   : > { %v1240_v28 = vpop.permute.xlu1 %1239 }
 0x163   : > { %1335 = vst.msk [vmem:[#allocation3 + $0x8] sm:$0xff] %vm1333_vm8, %v1240_v28  ;;  %v1464_v30 = vpop.permute.xlu0 %1463  ;;  %v1778_v28 = vld [vmem:[#allocation2 + $0x15a] sm:$0xff] }
 0x164   : > { %1859 = vrot.lane.b32.xlu1 %v3089_v48, %s2677_s4  ;;  %1544 = vst.msk [vmem:[#allocation3 + $0x80] sm:$0xff] %vm1527_vm9, %v1464_v30 }
 0x165   : > { %1443 = vrot.lane.b32.xlu0 %v2893_v59, %s2675_s25 }
 0x166   : > { %v1432_v49 = vpop.permute.xlu1 %1431 }
 0x167   : > { %1528 = vst.msk [vmem:[#allocation3] sm:$0xff] %vm1527_vm9, %v1432_v49  ;;  %v1466_v36 = vpop.permute.xlu0 %1465  ;;  %v1377_v49 = vld [vmem:[#allocation2 + $0xa8] sm:$0xff] }
 0x168   : > { %1283 = vrot.lane.b32.xlu1 %v3089_v48, %s2674_s24  ;;  %1545 = vst.msk [vmem:[#allocation3 + $0x88] sm:$0xff] %vm1527_vm9, %v1466_v36 }
 0x169   : > { %1445 = vrot.lane.b32.xlu0 %v2902_v60, %s2675_s25  ;;  %v1582_v60 = vld [vmem:[#allocation2 + $0x139] sm:$0xff] }
 0x16a   : > { %v1434_v39 = vpop.permute.xlu1 %1433 }
 0x16b   : > { %1529 = vst.msk [vmem:[#allocation3 + $0x8] sm:$0xff] %vm1527_vm9, %v1434_v39  ;;  %v1657_v59 = vpop.permute.xlu0 %1656 }
 0x16c   : > { %1475 = vrot.lane.b32.xlu1 %v2976_v15, %s2675_s25  ;;  %1737 = vst.msk [vmem:[#allocation3 + $0x80] sm:$0xff] %vm1720_vm10, %v1657_v59  ;;  %v1567_v15 = vld [vmem:[#allocation2 + $0x81] sm:$0xff]  ;;  %v1378_v59 = vld [vmem:[#allocation2 + $0xb0] sm:$0xff] }
 0x16d   : > { %1636 = vrot.lane.b32.xlu0 %v1566_v31, %s2676_s26 }
 0x16e   : > { %v1625_v47 = vpop.permute.xlu1 %1624 }
 0x16f   : > { %1721 = vst.msk [vmem:[#allocation3] sm:$0xff] %vm1720_vm10, %v1625_v47  ;;  %v1627_v48 = vpop.permute.xlu0 %1626 }
 0x170   : > { %1477 = vrot.lane.b32.xlu1 %v2978_v16, %s2675_s25  ;;  %1722 = vst.msk [vmem:[#allocation3 + $0x8] sm:$0xff] %vm1720_vm10, %v1627_v48  ;;  %v1759_v16 = vld [vmem:[#allocation2 + $0x7a] sm:$0xff]  ;;  %v1393_v48 = vld [vmem:[#allocation2 + $0x168] sm:$0xff] }
 0x171   : > { %1060 = vrot.lane.b32.xlu0 %v1566_v31, %s2673_s23 }
 0x172   : > { %v1081_v53 = vpop.permute.xlu1 %1080 }
 0x173   : > { %1159 = vst.msk [vmem:[#allocation3 + $0x90] sm:$0xff] %vm1140_vm7, %v1081_v53  ;;  %v1818_v40 = vpop.permute.xlu0 %1817  ;;  %v1570_v53 = vld [vmem:[#allocation2 + $0xa9] sm:$0xff] }
 0x174   : > { %1668 = vrot.lane.b32.xlu1 %v1582_v60, %s2676_s26  ;;  %1914 = vst.msk [vmem:[#allocation3] sm:$0xff] %vm1913_vm11, %v1818_v40  ;;  %v1394_v40 = vld [vmem:[#allocation2 + $0x170] sm:$0xff] }
 0x175   : > { %1638 = vrot.lane.b32.xlu0 %v1567_v15, %s2676_s26 }
 0x176   : > { %v1659_v17 = vpop.permute.xlu1 %1658 }
 0x177   : > { %1738 = vst.msk [vmem:[#allocation3 + $0x88] sm:$0xff] %vm1720_vm10, %v1659_v17  ;;  %v1051_v50 = vpop.permute.xlu0 %1050 }
 0x178   : > { %1092 = vrot.lane.b32.xlu1 %v1582_v60, %s2673_s23  ;;  %1144 = vst.msk [vmem:[#allocation3 + $0x18] sm:$0xff] %vm1140_vm7, %v1051_v50  ;;  %v1586_v50 = vld [vmem:[#allocation2 + $0x169] sm:$0xff] }
 0x179   : > { %1829 = vrot.lane.b32.xlu0 %v1759_v16, %s2677_s4 }
 0x17a   : > { %v1850_v32 = vpop.permute.xlu1 %1849 }
 0x17b   : > { %1930 = vst.msk [vmem:[#allocation3 + $0x80] sm:$0xff] %vm1913_vm11, %v1850_v32  ;;  %v1242_v43 = vpop.permute.xlu0 %1241  ;;  %v1946_v18 = vld [vmem:[#allocation3] sm:$0xff] }
 0x17c   : > { %1670 = vrot.lane.b32.xlu1 %v1583_v63, %s2676_s26  ;;  %1336 = vst.msk [vmem:[#allocation3 + $0x10] sm:$0xff] %vm1333_vm8, %v1242_v43  ;;  %2550 = vmatprep.mubr.msk.f32.mxu0 %vm1990_vm12, %v1946_v18  ;;  %v1571_v32 = vld [vmem:[#allocation2 + $0xb1] sm:$0xff] }
 0x17d   : > { %1062 = vrot.lane.b32.xlu0 %v1567_v15, %s2673_s23 }
 0x17e   : > { %v1083_v54 = vpop.permute.xlu1 %1082 }
 0x17f   : > { %1160 = vst.msk [vmem:[#allocation3 + $0x98] sm:$0xff] %vm1140_vm7, %v1083_v54  ;;  %v1820_v35 = vpop.permute.xlu0 %1819 }
 0x180   : > { %1861 = vrot.lane.b32.xlu1 %v1775_v61, %s2677_s4  ;;  %1915 = vst.msk [vmem:[#allocation3 + $0x8] sm:$0xff] %vm1913_vm11, %v1820_v35  ;;  %v1587_v35 = vld [vmem:[#allocation2 + $0x171] sm:$0xff] }
 0x181   : > { %1253 = vrot.lane.b32.xlu0 %v1759_v16, %s2674_s24 }
 0x182   : > { %v1274_v55 = vpop.permute.xlu1 %1273  ;;  %v1962_v8 = vld [vmem:[#allocation3 + $0x80] sm:$0xff] }
 0x183   : > { %1352 = vst.msk [vmem:[#allocation3 + $0x90] sm:$0xff] %vm1333_vm8, %v1274_v55  ;;  %2574 = vmatprep.mubr.msk.f32.mxu1 %vm1990_vm12, %v1962_v8  ;;  %v1244_v22 = vpop.permute.xlu0 %1243 }
 0x184   : > { %1094 = vrot.lane.b32.xlu1 %v1583_v63, %s2673_s23  ;;  %1337 = vst.msk [vmem:[#allocation3 + $0x18] sm:$0xff] %vm1333_vm8, %v1244_v22  ;;  %v1779_v22 = vld [vmem:[#allocation2 + $0x16a] sm:$0xff] }
 0x185   : > { %1831 = vrot.lane.b32.xlu0 %v1760_v23, %s2677_s4 }
 0x186   : > { %v1852_v9 = vpop.permute.xlu1 %1851 }
 0x187   : > { %1931 = vst.msk [vmem:[#allocation3 + $0x88] sm:$0xff] %vm1913_vm11, %v1852_v9  ;;  %v1436_v0 = vpop.permute.xlu0 %1435  ;;  %v1947_v24 = vld [vmem:[#allocation3 + $0x8] sm:$0xff] }
 0x188   : > { %1285 = vrot.lane.b32.xlu1 %v1775_v61, %s2674_s24  ;;  %1530 = vst.msk [vmem:[#allocation3 + $0x10] sm:$0xff] %vm1527_vm9, %v1436_v0  ;;  %2551 = vmatmul.mubr.msk.f32.vlgmr.msra.gmra.mrb[0].mxu0 %vm1990_vm12, %v1947_v24  ;;  %v1763_v61 = vld [vmem:[#allocation2 + $0xaa] sm:$0xff] }
 0x189   : > { %1255 = vrot.lane.b32.xlu0 %v1760_v23, %s2674_s24 }
 0x18a   : > { %v1276_v14 = vpop.permute.xlu1 %1275 }
 0x18b   : > { %1353 = vst.msk [vmem:[#allocation3 + $0x98] sm:$0xff] %vm1333_vm8, %v1276_v14  ;;  %v1438_v2 = vpop.permute.xlu0 %1437  ;;  %v1764_v14 = vld [vmem:[#allocation2 + $0xb2] sm:$0xff] }
 0x18c   : > { %1863 = vrot.lane.b32.xlu1 %v1776_v25, %s2677_s4  ;;  %1531 = vst.msk [vmem:[#allocation3 + $0x18] sm:$0xff] %vm1527_vm9, %v1438_v2 }
 0x18d   : > { %1447 = vrot.lane.b32.xlu0 %v1375_v62, %s2675_s25 }
 0x18e   : > { %v1468_v27 = vpop.permute.xlu1 %1467  ;;  %v1963_v13 = vld [vmem:[#allocation3 + $0x88] sm:$0xff] }
 0x18f   : > { %1546 = vst.msk [vmem:[#allocation3 + $0x90] sm:$0xff] %vm1527_vm9, %v1468_v27  ;;  %2575 = vmatmul.mubr.msk.f32.vlgmr.msra.gmra.mrb[0].mxu1 %vm1990_vm12, %v1963_v13  ;;  %v1629_v21 = vpop.permute.xlu0 %1628 }
 0x190   : > { %1287 = vrot.lane.b32.xlu1 %v1776_v25, %s2674_s24  ;;  %1723 = vst.msk [vmem:[#allocation3 + $0x10] sm:$0xff] %vm1720_vm10, %v1629_v21 }
 0x191   : > { %1449 = vrot.lane.b32.xlu0 %v1376_v42, %s2675_s25  ;;  %v1780_v42 = vld [vmem:[#allocation2 + $0x172] sm:$0xff] }
 0x192   : > { %v1470_v56 = vpop.permute.xlu1 %1469 }
 0x193   : > { %1547 = vst.msk [vmem:[#allocation3 + $0x98] sm:$0xff] %vm1527_vm9, %v1470_v56  ;;  %v1053_v45 = vpop.permute.xlu0 %1052  ;;  %v1379_v56 = vld [vmem:[#allocation2 + $0xc0] sm:$0xff] }
 0x194   : > { %1479 = vrot.lane.b32.xlu1 %v2990_v19, %s2675_s25  ;;  %1145 = vst.msk [vmem:[#allocation3 + $0x20] sm:$0xff] %vm1140_vm7, %v1053_v45  ;;  %v1569_v19 = vld [vmem:[#allocation2 + $0x99] sm:$0xff] }
 0x195   : > { %1640 = vrot.lane.b32.xlu0 %v1568_v34, %s2676_s26 }
 0x196   : > { %v1661_v29 = vpop.permute.xlu1 %1660 }
 0x197   : > { %1739 = vst.msk [vmem:[#allocation3 + $0x90] sm:$0xff] %vm1720_vm10, %v1661_v29  ;;  %v1631_v38 = vpop.permute.xlu0 %1630 }
 0x198   : > { %1481 = vrot.lane.b32.xlu1 %v2992_v20, %s2675_s25  ;;  %1724 = vst.msk [vmem:[#allocation3 + $0x18] sm:$0xff] %vm1720_vm10, %v1631_v38  ;;  %v1761_v20 = vld [vmem:[#allocation2 + $0x92] sm:$0xff]  ;;  %v1380_v38 = vld [vmem:[#allocation2 + $0xc8] sm:$0xff] }
 0x199   : > { %1064 = vrot.lane.b32.xlu0 %v1568_v34, %s2673_s23 }
 0x19a   : > { %v1085_v37 = vpop.permute.xlu1 %1084 }
 0x19b   : > { %1161 = vst.msk [vmem:[#allocation3 + $0xa0] sm:$0xff] %vm1140_vm7, %v1085_v37  ;;  %v1822_v33 = vpop.permute.xlu0 %1821  ;;  %v1395_v37 = vld [vmem:[#allocation2 + $0x180] sm:$0xff] }
 0x19c   : > { %1672 = vrot.lane.b32.xlu1 %v1584_v57, %s2676_s26  ;;  %1916 = vst.msk [vmem:[#allocation3 + $0x10] sm:$0xff] %vm1913_vm11, %v1822_v33  ;;  %v1572_v33 = vld [vmem:[#allocation2 + $0xc1] sm:$0xff] }
 0x19d   : > { %1642 = vrot.lane.b32.xlu0 %v1569_v19, %s2676_s26 }
 0x19e   : > { %v1663_v58 = vpop.permute.xlu1 %1662 }
 0x19f   : > { %1740 = vst.msk [vmem:[#allocation3 + $0x98] sm:$0xff] %vm1720_vm10, %v1663_v58  ;;  %v1055_v11 = vpop.permute.xlu0 %1054 }
 0x1a0   : > { %1096 = vrot.lane.b32.xlu1 %v1584_v57, %s2673_s23  ;;  %1146 = vst.msk [vmem:[#allocation3 + $0x28] sm:$0xff] %vm1140_vm7, %v1055_v11 }
 0x1a1   : > { %1833 = vrot.lane.b32.xlu0 %v1761_v20, %s2677_s4 }
 0x1a2   : > { %v1854_v6 = vpop.permute.xlu1 %1853 }
 0x1a3   : > { %1932 = vst.msk [vmem:[#allocation3 + $0x90] sm:$0xff] %vm1913_vm11, %v1854_v6  ;;  %v1246_v12 = vpop.permute.xlu0 %1245  ;;  %v1948_v51 = vld [vmem:[#allocation3 + $0x10] sm:$0xff] }
 0x1a4   : > { %1674 = vrot.lane.b32.xlu1 %v1585_v41, %s2676_s26  ;;  %1338 = vst.msk [vmem:[#allocation3 + $0x20] sm:$0xff] %vm1333_vm8, %v1246_v12  ;;  %2553 = vmatprep.mubr.msk.f32.mxu0 %vm1990_vm12, %v1948_v51  ;;  %v1588_v6 = vld [vmem:[#allocation2 + $0x181] sm:$0xff]  ;;  %v1573_v51 = vld [vmem:[#allocation2 + $0xc9] sm:$0xff] }
 0x1a5   : > { %1066 = vrot.lane.b32.xlu0 %v1569_v19, %s2673_s23 }
 0x1a6   : > { %v1087_v52 = vpop.permute.xlu1 %1086 }
 0x1a7   : > { %1162 = vst.msk [vmem:[#allocation3 + $0xa8] sm:$0xff] %vm1140_vm7, %v1087_v52  ;;  %v1824_v1 = vpop.permute.xlu0 %1823 }
 0x1a8   : > { %1865 = vrot.lane.b32.xlu1 %v1777_v7, %s2677_s4  ;;  %1917 = vst.msk [vmem:[#allocation3 + $0x18] sm:$0xff] %vm1913_vm11, %v1824_v1  ;;  %v1765_v1 = vld [vmem:[#allocation2 + $0xc2] sm:$0xff] }
 0x1a9   : > { %1257 = vrot.lane.b32.xlu0 %v1761_v20, %s2674_s24  ;;  %v1396_v20 = vld [vmem:[#allocation2 + $0x188] sm:$0xff] }
 0x1aa   : > { %v1278_v26 = vpop.permute.xlu1 %1277  ;;  %v1964_v4 = vld [vmem:[#allocation3 + $0x90] sm:$0xff] }
 0x1ab   : > { %1354 = vst.msk [vmem:[#allocation3 + $0xa0] sm:$0xff] %vm1333_vm8, %v1278_v26  ;;  %2577 = vmatprep.mubr.msk.f32.mxu1 %vm1990_vm12, %v1964_v4  ;;  %v1248_v3 = vpop.permute.xlu0 %1247  ;;  %v1589_v4 = vld [vmem:[#allocation2 + $0x189] sm:$0xff] }
 0x1ac   : > { %1098 = vrot.lane.b32.xlu1 %v1585_v41, %s2673_s23  ;;  %1339 = vst.msk [vmem:[#allocation3 + $0x28] sm:$0xff] %vm1333_vm8, %v1248_v3 }
 0x1ad   : > { %1835 = vrot.lane.b32.xlu0 %v1762_v44, %s2677_s4 }
 0x1ae   : > { %v1856_v10 = vpop.permute.xlu1 %1855 }
 0x1af   : > { %1933 = vst.msk [vmem:[#allocation3 + $0x98] sm:$0xff] %vm1913_vm11, %v1856_v10  ;;  %v1440_v46 = vpop.permute.xlu0 %1439  ;;  %v1949_v5 = vld [vmem:[#allocation3 + $0x18] sm:$0xff] }
 0x1b0   : > { %1289 = vrot.lane.b32.xlu1 %v1777_v7, %s2674_s24  ;;  %1532 = vst.msk [vmem:[#allocation3 + $0x20] sm:$0xff] %vm1527_vm9, %v1440_v46  ;;  %2554 = vmatmul.mubr.msk.f32.gmra.mrb[2].mxu0 %vm1990_vm12, %v1949_v5  ;;  %v1781_v46 = vld [vmem:[#allocation2 + $0x182] sm:$0xff] }
 0x1b1   : > { %1259 = vrot.lane.b32.xlu0 %v1762_v44, %s2674_s24 }
 0x1b2   : > { %v1280_v30 = vpop.permute.xlu1 %1279 }
 0x1b3   : > { %1355 = vst.msk [vmem:[#allocation3 + $0xa8] sm:$0xff] %vm1333_vm8, %v1280_v30  ;;  %v1442_v36 = vpop.permute.xlu0 %1441 }
 0x1b4   : > { %1867 = vrot.lane.b32.xlu1 %v1778_v28, %s2677_s4  ;;  %1533 = vst.msk [vmem:[#allocation3 + $0x28] sm:$0xff] %vm1527_vm9, %v1442_v36  ;;  %v1766_v36 = vld [vmem:[#allocation2 + $0xca] sm:$0xff] }
 0x1b5   : > { %1451 = vrot.lane.b32.xlu0 %v1377_v49, %s2675_s25 }
 0x1b6   : > { %v1472_v39 = vpop.permute.xlu1 %1471  ;;  %v1965_v31 = vld [vmem:[#allocation3 + $0x98] sm:$0xff] }
 0x1b7   : > { %1548 = vst.msk [vmem:[#allocation3 + $0xa0] sm:$0xff] %vm1527_vm9, %v1472_v39  ;;  %2578 = vmatmul.mubr.msk.f32.gmra.mrb[2].mxu1 %vm1990_vm12, %v1965_v31  ;;  %v1633_v47 = vpop.permute.xlu0 %1632 }
 0x1b8   : > { %1291 = vrot.lane.b32.xlu1 %v1778_v28, %s2674_s24  ;;  %1725 = vst.msk [vmem:[#allocation3 + $0x20] sm:$0xff] %vm1720_vm10, %v1633_v47 }
 0x1b9   : > { %1453 = vrot.lane.b32.xlu0 %v1378_v59, %s2675_s25 }
 0x1ba   : > { %v1474_v60 = vpop.permute.xlu1 %1473 }
 0x1bb   : > { %1549 = vst.msk [vmem:[#allocation3 + $0xa8] sm:$0xff] %vm1527_vm9, %v1474_v60  ;;  %v1057_v15 = vpop.permute.xlu0 %1056 }
 0x1bc   : > { %1483 = vrot.lane.b32.xlu1 %v1393_v48, %s2675_s25  ;;  %1147 = vst.msk [vmem:[#allocation3 + $0x30] sm:$0xff] %vm1140_vm7, %v1057_v15  ;;  %v1782_v48 = vld [vmem:[#allocation2 + $0x18a] sm:$0xff] }
 0x1bd   : > { %1644 = vrot.lane.b32.xlu0 %v1570_v53, %s2676_s26 }
 0x1be   : > { %v1665_v17 = vpop.permute.xlu1 %1664 }
 0x1bf   : > { %1741 = vst.msk [vmem:[#allocation3 + $0xa0] sm:$0xff] %vm1720_vm10, %v1665_v17  ;;  %v1635_v16 = vpop.permute.xlu0 %1634 }
 0x1c0   : > { %1485 = vrot.lane.b32.xlu1 %v1394_v40, %s2675_s25  ;;  %1726 = vst.msk [vmem:[#allocation3 + $0x28] sm:$0xff] %vm1720_vm10, %v1635_v16  ;;  %v1382_v16 = vld [vmem:[#allocation2 + $0xe0] sm:$0xff] }
 0x1c1   : > { %1068 = vrot.lane.b32.xlu0 %v1570_v53, %s2673_s23  ;;  %v1381_v53 = vld [vmem:[#allocation2 + $0xd8] sm:$0xff] }
 0x1c2   : > { %v1089_v63 = vpop.permute.xlu1 %1088 }
 0x1c3   : > { %1163 = vst.msk [vmem:[#allocation3 + $0xb0] sm:$0xff] %vm1140_vm7, %v1089_v63  ;;  %v1826_v43 = vpop.permute.xlu0 %1825  ;;  %v1397_v63 = vld [vmem:[#allocation2 + $0x198] sm:$0xff] }
 0x1c4   : > { %1676 = vrot.lane.b32.xlu1 %v1586_v50, %s2676_s26  ;;  %1918 = vst.msk [vmem:[#allocation3 + $0x20] sm:$0xff] %vm1913_vm11, %v1826_v43  ;;  %v1574_v43 = vld [vmem:[#allocation2 + $0xd9] sm:$0xff] }
 0x1c5   : > { %1646 = vrot.lane.b32.xlu0 %v1571_v32, %s2676_s26 }
 0x1c6   : > { %v1667_v18 = vpop.permute.xlu1 %1666 }
 0x1c7   : > { %1742 = vst.msk [vmem:[#allocation3 + $0xa8] sm:$0xff] %vm1720_vm10, %v1667_v18  ;;  %v1059_v54 = vpop.permute.xlu0 %1058 }
 0x1c8   : > { %1100 = vrot.lane.b32.xlu1 %v1586_v50, %s2673_s23  ;;  %1148 = vst.msk [vmem:[#allocation3 + $0x38] sm:$0xff] %vm1140_vm7, %v1059_v54 }
 0x1c9   : > { %1837 = vrot.lane.b32.xlu0 %v1763_v61, %s2677_s4 }
 0x1ca   : > { %v1858_v55 = vpop.permute.xlu1 %1857 }
 0x1cb   : > { %1934 = vst.msk [vmem:[#allocation3 + $0xa0] sm:$0xff] %vm1913_vm11, %v1858_v55  ;;  %v1250_v8 = vpop.permute.xlu0 %1249  ;;  %v1950_v23 = vld [vmem:[#allocation3 + $0x20] sm:$0xff] }
 0x1cc   : > { %1678 = vrot.lane.b32.xlu1 %v1587_v35, %s2676_s26  ;;  %1340 = vst.msk [vmem:[#allocation3 + $0x30] sm:$0xff] %vm1333_vm8, %v1250_v8  ;;  %2556 = vmatprep.mubr.msk.f32.mxu0 %vm1990_vm12, %v1950_v23  ;;  %v1590_v8 = vld [vmem:[#allocation2 + $0x199] sm:$0xff] }
 0x1cd   : > { %1070 = vrot.lane.b32.xlu0 %v1571_v32, %s2673_s23 }
 0x1ce   : > { %v1091_v9 = vpop.permute.xlu1 %1090 }
 0x1cf   : > { %1164 = vst.msk [vmem:[#allocation3 + $0xb8] sm:$0xff] %vm1140_vm7, %v1091_v9  ;;  %v1828_v0 = vpop.permute.xlu0 %1827 }
 0x1d0   : > { %1869 = vrot.lane.b32.xlu1 %v1779_v22, %s2677_s4  ;;  %1919 = vst.msk [vmem:[#allocation3 + $0x28] sm:$0xff] %vm1913_vm11, %v1828_v0  ;;  %v1591_v0 = vld [vmem:[#allocation2 + $0x1a1] sm:$0xff] }
 0x1d1   : > { %1261 = vrot.lane.b32.xlu0 %v1763_v61, %s2674_s24  ;;  %v1398_v61 = vld [vmem:[#allocation2 + $0x1a0] sm:$0xff] }
 0x1d2   : > { %v1282_v24 = vpop.permute.xlu1 %1281  ;;  %v1966_v25 = vld [vmem:[#allocation3 + $0xa0] sm:$0xff] }
 0x1d3   : > { %1356 = vst.msk [vmem:[#allocation3 + $0xb0] sm:$0xff] %vm1333_vm8, %v1282_v24  ;;  %2580 = vmatprep.mubr.msk.f32.mxu1 %vm1990_vm12, %v1966_v25  ;;  %v1252_v62 = vpop.permute.xlu0 %1251  ;;  %v1768_v25 = vld [vmem:[#allocation2 + $0xe2] sm:$0xff] }
 0x1d4   : > { %1102 = vrot.lane.b32.xlu1 %v1587_v35, %s2673_s23  ;;  %1341 = vst.msk [vmem:[#allocation3 + $0x38] sm:$0xff] %vm1333_vm8, %v1252_v62  ;;  %v1575_v35 = vld [vmem:[#allocation2 + $0xe1] sm:$0xff] }
 0x1d5   : > { %1839 = vrot.lane.b32.xlu0 %v1764_v14, %s2677_s4  ;;  %v1783_v62 = vld [vmem:[#allocation2 + $0x19a] sm:$0xff] }
 0x1d6   : > { %v1860_v2 = vpop.permute.xlu1 %1859 }
 0x1d7   : > { %1935 = vst.msk [vmem:[#allocation3 + $0xa8] sm:$0xff] %vm1913_vm11, %v1860_v2  ;;  %v1444_v27 = vpop.permute.xlu0 %1443  ;;  %v1951_v13 = vld [vmem:[#allocation3 + $0x28] sm:$0xff] }
 0x1d8   : > { %1293 = vrot.lane.b32.xlu1 %v1779_v22, %s2674_s24  ;;  %1534 = vst.msk [vmem:[#allocation3 + $0x30] sm:$0xff] %vm1527_vm9, %v1444_v27  ;;  %2557 = vmatmul.mubr.msk.f32.gmra.mrb[4].mxu0 %vm1990_vm12, %v1951_v13  ;;  %v1767_v22 = vld [vmem:[#allocation2 + $0xda] sm:$0xff] }
 0x1d9   : > { %1263 = vrot.lane.b32.xlu0 %v1764_v14, %s2674_s24 }
 0x1da   : > { %v1284_v21 = vpop.permute.xlu1 %1283 }
 0x1db   : > { %1357 = vst.msk [vmem:[#allocation3 + $0xb8] sm:$0xff] %vm1333_vm8, %v1284_v21  ;;  %v1446_v34 = vpop.permute.xlu0 %1445 }
 0x1dc   : > { %1871 = vrot.lane.b32.xlu1 %v1780_v42, %s2677_s4  ;;  %1535 = vst.msk [vmem:[#allocation3 + $0x38] sm:$0xff] %vm1527_vm9, %v1446_v34 }
 0x1dd   : > { %1455 = vrot.lane.b32.xlu0 %v1379_v56, %s2675_s25 }
 0x1de   : > { %v1476_v45 = vpop.permute.xlu1 %1475  ;;  %v1967_v29 = vld [vmem:[#allocation3 + $0xa8] sm:$0xff] }
 0x1df   : > { %1550 = vst.msk [vmem:[#allocation3 + $0xb0] sm:$0xff] %vm1527_vm9, %v1476_v45  ;;  %2581 = vmatmul.mubr.msk.f32.gmra.mrb[4].mxu1 %vm1990_vm12, %v1967_v29  ;;  %v1637_v57 = vpop.permute.xlu0 %1636 }
 0x1e0   : > { %1295 = vrot.lane.b32.xlu1 %v1780_v42, %s2674_s24  ;;  %1727 = vst.msk [vmem:[#allocation3 + $0x30] sm:$0xff] %vm1720_vm10, %v1637_v57  ;;  %v1784_v42 = vld [vmem:[#allocation2 + $0x1a2] sm:$0xff] }
 0x1e1   : > { %1457 = vrot.lane.b32.xlu0 %v1380_v38, %s2675_s25 }
 0x1e2   : > { %v1478_v19 = vpop.permute.xlu1 %1477 }
 0x1e3   : > { %1551 = vst.msk [vmem:[#allocation3 + $0xb8] sm:$0xff] %vm1527_vm9, %v1478_v19  ;;  %v1061_v58 = vpop.permute.xlu0 %1060 }
 0x1e4   : > { %1487 = vrot.lane.b32.xlu1 %v1395_v37, %s2675_s25  ;;  %1149 = vst.msk [vmem:[#allocation3 + $0x40] sm:$0xff] %vm1140_vm7, %v1061_v58 }
 0x1e5   : > { %1648 = vrot.lane.b32.xlu0 %v1572_v33, %s2676_s26 }
 0x1e6   : > { %v1669_v11 = vpop.permute.xlu1 %1668 }
 0x1e7   : > { %1743 = vst.msk [vmem:[#allocation3 + $0xb0] sm:$0xff] %vm1720_vm10, %v1669_v11  ;;  %v1639_v41 = vpop.permute.xlu0 %1638 }
 0x1e8   : > { %1489 = vrot.lane.b32.xlu1 %v1396_v20, %s2675_s25  ;;  %1728 = vst.msk [vmem:[#allocation3 + $0x38] sm:$0xff] %vm1720_vm10, %v1639_v41 }
 0x1e9   : > { %1072 = vrot.lane.b32.xlu0 %v1572_v33, %s2673_s23 }
 0x1ea   : > { %v1093_v12 = vpop.permute.xlu1 %1092 }
 0x1eb   : > { %1165 = vst.msk [vmem:[#allocation3 + $0xc0] sm:$0xff] %vm1140_vm7, %v1093_v12  ;;  %v1830_v7 = vpop.permute.xlu0 %1829 }
 0x1ec   : > { %1680 = vrot.lane.b32.xlu1 %v1588_v6, %s2676_s26  ;;  %1920 = vst.msk [vmem:[#allocation3 + $0x30] sm:$0xff] %vm1913_vm11, %v1830_v7 }
 0x1ed   : > { %1650 = vrot.lane.b32.xlu0 %v1573_v51, %s2676_s26 }
 0x1ee   : > { %v1671_v52 = vpop.permute.xlu1 %1670 }
 0x1ef   : > { %1744 = vst.msk [vmem:[#allocation3 + $0xb8] sm:$0xff] %vm1720_vm10, %v1671_v52  ;;  %v1063_v26 = vpop.permute.xlu0 %1062 }
 0x1f0   : > { %1104 = vrot.lane.b32.xlu1 %v1588_v6, %s2673_s23  ;;  %1150 = vst.msk [vmem:[#allocation3 + $0x48] sm:$0xff] %vm1140_vm7, %v1063_v26 }
 0x1f1   : > { %1841 = vrot.lane.b32.xlu0 %v1765_v1, %s2677_s4 }
 0x1f2   : > { %v1862_v44 = vpop.permute.xlu1 %1861 }
 0x1f3   : > { %1936 = vst.msk [vmem:[#allocation3 + $0xb0] sm:$0xff] %vm1913_vm11, %v1862_v44  ;;  %v1254_v3 = vpop.permute.xlu0 %1253  ;;  %v1952_v10 = vld [vmem:[#allocation3 + $0x30] sm:$0xff] }
 0x1f4   : > { %1682 = vrot.lane.b32.xlu1 %v1589_v4, %s2676_s26  ;;  %1342 = vst.msk [vmem:[#allocation3 + $0x40] sm:$0xff] %vm1333_vm8, %v1254_v3  ;;  %2559 = vmatprep.mubr.msk.f32.mxu0 %vm1990_vm12, %v1952_v10 }
 0x1f5   : > { %1074 = vrot.lane.b32.xlu0 %v1573_v51, %s2673_s23 }
 0x1f6   : > { %v1095_v5 = vpop.permute.xlu1 %1094 }
 0x1f7   : > { %1166 = vst.msk [vmem:[#allocation3 + $0xc8] sm:$0xff] %vm1140_vm7, %v1095_v5  ;;  %v1832_v28 = vpop.permute.xlu0 %1831 }
 0x1f8   : > { %1873 = vrot.lane.b32.xlu1 %v1781_v46, %s2677_s4  ;;  %1921 = vst.msk [vmem:[#allocation3 + $0x38] sm:$0xff] %vm1913_vm11, %v1832_v28 }
 0x1f9   : > { %1265 = vrot.lane.b32.xlu0 %v1765_v1, %s2674_s24 }
 0x1fa   : > { %v1286_v30 = vpop.permute.xlu1 %1285  ;;  %v1968_v49 = vld [vmem:[#allocation3 + $0xb0] sm:$0xff] }
 0x1fb   : > { %1358 = vst.msk [vmem:[#allocation3 + $0xc0] sm:$0xff] %vm1333_vm8, %v1286_v30  ;;  %2583 = vmatprep.mubr.msk.f32.mxu1 %vm1990_vm12, %v1968_v49  ;;  %v1256_v39 = vpop.permute.xlu0 %1255 }
 0x1fc   : > { %1106 = vrot.lane.b32.xlu1 %v1589_v4, %s2673_s23  ;;  %1343 = vst.msk [vmem:[#allocation3 + $0x48] sm:$0xff] %vm1333_vm8, %v1256_v39 }
 0x1fd   : > { %1843 = vrot.lane.b32.xlu0 %v1766_v36, %s2677_s4 }
 0x1fe   : > { %v1864_v31 = vpop.permute.xlu1 %1863 }
 0x1ff   : > { %1937 = vst.msk [vmem:[#allocation3 + $0xb8] sm:$0xff] %vm1913_vm11, %v1864_v31  ;;  %v1448_v59 = vpop.permute.xlu0 %1447  ;;  %v1953_v47 = vld [vmem:[#allocation3 + $0x38] sm:$0xff] }
 0x200   : > { %1297 = vrot.lane.b32.xlu1 %v1781_v46, %s2674_s24  ;;  %1536 = vst.msk [vmem:[#allocation3 + $0x40] sm:$0xff] %vm1527_vm9, %v1448_v59  ;;  %2560 = vmatmul.mubr.msk.f32.gmra.mrb[6].mxu0 %vm1990_vm12, %v1953_v47 }
 0x201   : > { %1267 = vrot.lane.b32.xlu0 %v1766_v36, %s2674_s24 }
 0x202   : > { %v1288_v60 = vpop.permute.xlu1 %1287 }
 0x203   : > { %1359 = vst.msk [vmem:[#allocation3 + $0xc8] sm:$0xff] %vm1333_vm8, %v1288_v60  ;;  %v1450_v15 = vpop.permute.xlu0 %1449 }
 0x204   : > { %1875 = vrot.lane.b32.xlu1 %v1782_v48, %s2677_s4  ;;  %1537 = vst.msk [vmem:[#allocation3 + $0x48] sm:$0xff] %vm1527_vm9, %v1450_v15  ;;  %v3650_v15 = vld [vmem:[%s3802_s2] ss:$0 sm:$0xff] }
 0x205   : > { %1459 = vrot.lane.b32.xlu0 %v1381_v53, %s2675_s25 }
 0x206   : > { %v1480_v40 = vpop.permute.xlu1 %1479  ;;  %v1969_v17 = vld [vmem:[#allocation3 + $0xb8] sm:$0xff] }
 0x207   : > { %1552 = vst.msk [vmem:[#allocation3 + $0xc0] sm:$0xff] %vm1527_vm9, %v1480_v40  ;;  %2584 = vmatmul.mubr.msk.f32.gmra.mrb[6].mxu1 %vm1990_vm12, %v1969_v17  ;;  %v1641_v50 = vpop.permute.xlu0 %1640 }
 0x208   : > { %1299 = vrot.lane.b32.xlu1 %v1782_v48, %s2674_s24  ;;  %1729 = vst.msk [vmem:[#allocation3 + $0x40] sm:$0xff] %vm1720_vm10, %v1641_v50 }
 0x209   : > { %1461 = vrot.lane.b32.xlu0 %v1382_v16, %s2675_s25 }
 0x20a   : > { %v1482_v32 = vpop.permute.xlu1 %1481 }
 0x20b   : > { %1553 = vst.msk [vmem:[#allocation3 + $0xc8] sm:$0xff] %vm1527_vm9, %v1482_v32  ;;  %v1065_v18 = vpop.permute.xlu0 %1064 }
 0x20c   : > { %1491 = vrot.lane.b32.xlu1 %v1397_v63, %s2675_s25  ;;  %1151 = vst.msk [vmem:[#allocation3 + $0x50] sm:$0xff] %vm1140_vm7, %v1065_v18 }
 0x20d   : > { %1652 = vrot.lane.b32.xlu0 %v1574_v43, %s2676_s26 }
 0x20e   : > { %v1673_v54 = vpop.permute.xlu1 %1672 }
 0x20f   : > { %1745 = vst.msk [vmem:[#allocation3 + $0xc0] sm:$0xff] %vm1720_vm10, %v1673_v54  ;;  %v1643_v55 = vpop.permute.xlu0 %1642 }
 0x210   : > { %1493 = vrot.lane.b32.xlu1 %v1398_v61, %s2675_s25  ;;  %1730 = vst.msk [vmem:[#allocation3 + $0x48] sm:$0xff] %vm1720_vm10, %v1643_v55 }
 0x211   : > { %1654 = vrot.lane.b32.xlu0 %v1575_v35, %s2676_s26 }
 0x212   : > { %v1097_v23 = vpop.permute.xlu1 %1096 }
 0x213   : > { %1167 = vst.msk [vmem:[#allocation3 + $0xd0] sm:$0xff] %vm1140_vm7, %v1097_v23  ;;  %v1834_v9 = vpop.permute.xlu0 %1833 }
 0x214   : > { %1684 = vrot.lane.b32.xlu1 %v1590_v8, %s2676_s26  ;;  %1922 = vst.msk [vmem:[#allocation3 + $0x40] sm:$0xff] %vm1913_vm11, %v1834_v9 }
 0x215   : > { %1845 = vrot.lane.b32.xlu0 %v1767_v22, %s2677_s4 }
 0x216   : > { %v1675_v24 = vpop.permute.xlu1 %1674 }
 0x217   : > { %1746 = vst.msk [vmem:[#allocation3 + $0xc8] sm:$0xff] %vm1720_vm10, %v1675_v24  ;;  %v1067_v14 = vpop.permute.xlu0 %1066 }
 0x218   : > { %1686 = vrot.lane.b32.xlu1 %v1591_v0, %s2676_s26  ;;  %1152 = vst.msk [vmem:[#allocation3 + $0x58] sm:$0xff] %vm1140_vm7, %v1067_v14 }
 0x219   : > { %1847 = vrot.lane.b32.xlu0 %v1768_v25, %s2677_s4 }
 0x21a   : > { %v1866_v2 = vpop.permute.xlu1 %1865 }
 0x21b   : > { %1938 = vst.msk [vmem:[#allocation3 + $0xc0] sm:$0xff] %vm1913_vm11, %v1866_v2  ;;  %v1258_v27 = vpop.permute.xlu0 %1257  ;;  %v1954_v13 = vld [vmem:[#allocation3 + $0x40] sm:$0xff] }
 0x21c   : > { %1877 = vrot.lane.b32.xlu1 %v1783_v62, %s2677_s4  ;;  %1344 = vst.msk [vmem:[#allocation3 + $0x50] sm:$0xff] %vm1333_vm8, %v1258_v27  ;;  %2562 = vmatprep.mubr.msk.f32.mxu0 %vm1990_vm12, %v1954_v13 }
 0x21e   : > { %v1099_v21 = vpop.permute.xlu1 %1098 }
 0x21f   : > { %1168 = vst.msk [vmem:[#allocation3 + $0xd8] sm:$0xff] %vm1140_vm7, %v1099_v21  ;;  %v1836_v56 = vpop.permute.xlu0 %1835 }
 0x220   : > { %1879 = vrot.lane.b32.xlu1 %v1784_v42, %s2677_s4  ;;  %1923 = vst.msk [vmem:[#allocation3 + $0x48] sm:$0xff] %vm1913_vm11, %v1836_v56 }
 0x222   : > { %v1290_v34 = vpop.permute.xlu1 %1289  ;;  %v1970_v45 = vld [vmem:[#allocation3 + $0xc0] sm:$0xff] }
 0x223   : > { %1360 = vst.msk [vmem:[#allocation3 + $0xd0] sm:$0xff] %vm1333_vm8, %v1290_v34  ;;  %2586 = vmatprep.mubr.msk.f32.mxu1 %vm1990_vm12, %v1970_v45  ;;  %v1260_v29 = vpop.permute.xlu0 %1259 }
 0x224   : > { %1345 = vst.msk [vmem:[#allocation3 + $0x58] sm:$0xff] %vm1333_vm8, %v1260_v29 }
 0x226   : > { %v1868_v38 = vpop.permute.xlu1 %1867 }
 0x227   : > { %1939 = vst.msk [vmem:[#allocation3 + $0xc8] sm:$0xff] %vm1913_vm11, %v1868_v38  ;;  %v1452_v57 = vpop.permute.xlu0 %1451  ;;  %v1955_v37 = vld [vmem:[#allocation3 + $0x48] sm:$0xff] }
 0x228   : > { %1538 = vst.msk [vmem:[#allocation3 + $0x50] sm:$0xff] %vm1527_vm9, %v1452_v57  ;;  %2563 = vmatmul.mubr.msk.f32.gmra.mrb[8].mxu0 %vm1990_vm12, %v1955_v37 }
 0x22a   : > { %v1292_v19 = vpop.permute.xlu1 %1291 }
 0x22b   : > { %1361 = vst.msk [vmem:[#allocation3 + $0xd8] sm:$0xff] %vm1333_vm8, %v1292_v19  ;;  %v1454_v33 = vpop.permute.xlu0 %1453 }
 0x22c   : > { %1539 = vst.msk [vmem:[#allocation3 + $0x58] sm:$0xff] %vm1527_vm9, %v1454_v33 }
 0x22e   : > { %v1484_v58 = vpop.permute.xlu1 %1483  ;;  %v1971_v20 = vld [vmem:[#allocation3 + $0xc8] sm:$0xff] }
 0x22f   : > { %1554 = vst.msk [vmem:[#allocation3 + $0xd0] sm:$0xff] %vm1527_vm9, %v1484_v58  ;;  %2587 = vmatmul.mubr.msk.f32.gmra.mrb[8].mxu1 %vm1990_vm12, %v1971_v20  ;;  %v1645_v11 = vpop.permute.xlu0 %1644 }
 0x230   : > { %1731 = vst.msk [vmem:[#allocation3 + $0x50] sm:$0xff] %vm1720_vm10, %v1645_v11 }
 0x232   : > { %v1486_v41 = vpop.permute.xlu1 %1485 }
 0x233   : > { %1555 = vst.msk [vmem:[#allocation3 + $0xd8] sm:$0xff] %vm1527_vm9, %v1486_v41  ;;  %v1069_v6 = vpop.permute.xlu0 %1068 }
 0x234   : > { %1153 = vst.msk [vmem:[#allocation3 + $0x60] sm:$0xff] %vm1140_vm7, %v1069_v6 }
 0x236   : > { %v1677_v12 = vpop.permute.xlu1 %1676 }
 0x237   : > { %1747 = vst.msk [vmem:[#allocation3 + $0xd0] sm:$0xff] %vm1720_vm10, %v1677_v12  ;;  %v1647_v51 = vpop.permute.xlu0 %1646 }
 0x238   : > { %1732 = vst.msk [vmem:[#allocation3 + $0x58] sm:$0xff] %vm1720_vm10, %v1647_v51 }
 0x23a   : > { %v1101_v7 = vpop.permute.xlu1 %1100 }
 0x23b   : > { %1169 = vst.msk [vmem:[#allocation3 + $0xe0] sm:$0xff] %vm1140_vm7, %v1101_v7  ;;  %v1838_v52 = vpop.permute.xlu0 %1837 }
 0x23c   : > { %1924 = vst.msk [vmem:[#allocation3 + $0x50] sm:$0xff] %vm1913_vm11, %v1838_v52 }
 0x23e   : > { %v1679_v1 = vpop.permute.xlu1 %1678 }
 0x23f   : > { %1748 = vst.msk [vmem:[#allocation3 + $0xd8] sm:$0xff] %vm1720_vm10, %v1679_v1  ;;  %v1071_v26 = vpop.permute.xlu0 %1070 }
 0x240   : > { %1154 = vst.msk [vmem:[#allocation3 + $0x68] sm:$0xff] %vm1140_vm7, %v1071_v26 }
 0x242   : > { %v1870_v4 = vpop.permute.xlu1 %1869 }
 0x243   : > { %1940 = vst.msk [vmem:[#allocation3 + $0xd0] sm:$0xff] %vm1913_vm11, %v1870_v4  ;;  %v1262_v44 = vpop.permute.xlu0 %1261  ;;  %v1956_v3 = vld [vmem:[#allocation3 + $0x50] sm:$0xff] }
 0x244   : > { %1346 = vst.msk [vmem:[#allocation3 + $0x60] sm:$0xff] %vm1333_vm8, %v1262_v44  ;;  %2565 = vmatprep.mubr.msk.f32.mxu0 %vm1990_vm12, %v1956_v3 }
 0x246   : > { %v1103_v10 = vpop.permute.xlu1 %1102 }
 0x247   : > { %1170 = vst.msk [vmem:[#allocation3 + $0xe8] sm:$0xff] %vm1140_vm7, %v1103_v10  ;;  %v1840_v46 = vpop.permute.xlu0 %1839 }
 0x248   : > { %1925 = vst.msk [vmem:[#allocation3 + $0x58] sm:$0xff] %vm1913_vm11, %v1840_v46 }
 0x24a   : > { %v1294_v5 = vpop.permute.xlu1 %1293  ;;  %v1972_v28 = vld [vmem:[#allocation3 + $0xd0] sm:$0xff] }
 0x24b   : > { %1362 = vst.msk [vmem:[#allocation3 + $0xe0] sm:$0xff] %vm1333_vm8, %v1294_v5  ;;  %2589 = vmatprep.mubr.msk.f32.mxu1 %vm1990_vm12, %v1972_v28  ;;  %v1264_v30 = vpop.permute.xlu0 %1263 }
 0x24c   : > { %1347 = vst.msk [vmem:[#allocation3 + $0x68] sm:$0xff] %vm1333_vm8, %v1264_v30 }
 0x24e   : > { %v1872_v49 = vpop.permute.xlu1 %1871 }
 0x24f   : > { %1941 = vst.msk [vmem:[#allocation3 + $0xd8] sm:$0xff] %vm1913_vm11, %v1872_v49  ;;  %v1456_v36 = vpop.permute.xlu0 %1455  ;;  %v1957_v39 = vld [vmem:[#allocation3 + $0x58] sm:$0xff] }
 0x250   : > { %1540 = vst.msk [vmem:[#allocation3 + $0x60] sm:$0xff] %vm1527_vm9, %v1456_v36  ;;  %2566 = vmatmul.mubr.msk.f32.gmra.mrb[10].mxu0 %vm1990_vm12, %v1957_v39 }
 0x252   : > { %v1296_v31 = vpop.permute.xlu1 %1295 }
 0x253   : > { %1363 = vst.msk [vmem:[#allocation3 + $0xe8] sm:$0xff] %vm1333_vm8, %v1296_v31  ;;  %v1458_v59 = vpop.permute.xlu0 %1457 }
 0x254   : > { %1541 = vst.msk [vmem:[#allocation3 + $0x68] sm:$0xff] %vm1527_vm9, %v1458_v59 }
 0x256   : > { %v1488_v47 = vpop.permute.xlu1 %1487  ;;  %v1973_v48 = vld [vmem:[#allocation3 + $0xd8] sm:$0xff] }
 0x257   : > { %1556 = vst.msk [vmem:[#allocation3 + $0xe0] sm:$0xff] %vm1527_vm9, %v1488_v47  ;;  %2590 = vmatmul.mubr.msk.f32.gmra.mrb[10].mxu1 %vm1990_vm12, %v1973_v48  ;;  %v1649_v60 = vpop.permute.xlu0 %1648 }
 0x258   : > { %1733 = vst.msk [vmem:[#allocation3 + $0x60] sm:$0xff] %vm1720_vm10, %v1649_v60 }
 0x25a   : > { %v1490_v53 = vpop.permute.xlu1 %1489 }
 0x25b   : > { %1557 = vst.msk [vmem:[#allocation3 + $0xe8] sm:$0xff] %vm1527_vm9, %v1490_v53  ;;  %v1073_v40 = vpop.permute.xlu0 %1072  ;;  %v2552_v17 = vpop.f32.mrb[0].mxu0 }
 0x25c   : > { %1155 = vst.msk [vmem:[#allocation3 + $0x70] sm:$0xff] %vm1140_vm7, %v1073_v40  ;;  %v2163_v16 = vadd.f32 %v2552_v17, %v3650_v15  ;;  %v2157_v50 = vpop.f32.mrb[1].mxu0 }
 0x25d   : > { %v2158_v32 = vadd.f32 %v3650_v15, %v2157_v50 }
 0x25e   : > { %v1681_v63 = vpop.permute.xlu1 %1680  ;;  %2318 = vst.msk [vmem:[%s3658_s20 + $0x8] sm:$0xff] %vm2316_vm13, %v2163_v16 }
 0x25f   : > { %1749 = vst.msk [vmem:[#allocation3 + $0xe0] sm:$0xff] %vm1720_vm10, %v1681_v63  ;;  %v1651_v43 = vpop.permute.xlu0 %1650 }
 0x260   : > { %2317 = vst.msk [vmem:[%s3658_s20] sm:$0xff] %vm2316_vm13, %v2158_v32 }
 0x261   : > { %1734 = vst.msk [vmem:[#allocation3 + $0x68] sm:$0xff] %vm1720_vm10, %v1651_v43 }
 0x262   : > { %v2576_v18 = vpop.f32.mrb[0].mxu1  ;;  %v1105_v61 = vpop.permute.xlu1 %1104 }
 0x263   : > { %v2243_v54 = vadd.f32 %v2576_v18, %v3650_v15  ;;  %1171 = vst.msk [vmem:[#allocation3 + $0xf0] sm:$0xff] %vm1140_vm7, %v1105_v61  ;;  %v2237_v35 = vpop.f32.mrb[1].mxu1  ;;  %v1842_v8 = vpop.permute.xlu0 %1841 }
 0x264   : > { %v2238_v55 = vadd.f32 %v3650_v15, %v2237_v35  ;;  %1926 = vst.msk [vmem:[#allocation3 + $0x60] sm:$0xff] %vm1913_vm11, %v1842_v8 }
 0x265   : > { %2334 = vst.msk [vmem:[%s3658_s20 + $0x88] sm:$0xff] %vm2316_vm13, %v2243_v54 }
 0x266   : > { %2333 = vst.msk [vmem:[%s3658_s20 + $0x80] sm:$0xff] %vm2316_vm13, %v2238_v55  ;;  %v1683_v23 = vpop.permute.xlu1 %1682 }
 0x267   : > { %1750 = vst.msk [vmem:[#allocation3 + $0xe8] sm:$0xff] %vm1720_vm10, %v1683_v23  ;;  %v1075_v22 = vpop.permute.xlu0 %1074 }
 0x268   : > { %1156 = vst.msk [vmem:[#allocation3 + $0x78] sm:$0xff] %vm1140_vm7, %v1075_v22 }
 0x26a   : > { %v1874_v9 = vpop.permute.xlu1 %1873 }
 0x26b   : > { %1942 = vst.msk [vmem:[#allocation3 + $0xe0] sm:$0xff] %vm1913_vm11, %v1874_v9  ;;  %v1266_v0 = vpop.permute.xlu0 %1265  ;;  %v1958_v24 = vld [vmem:[#allocation3 + $0x60] sm:$0xff] }
 0x26c   : > { %1348 = vst.msk [vmem:[#allocation3 + $0x70] sm:$0xff] %vm1333_vm8, %v1266_v0  ;;  %2568 = vmatprep.mubr.msk.f32.mxu0 %vm1990_vm12, %v1958_v24 }
 0x26e   : > { %v1107_v25 = vpop.permute.xlu1 %1106 }
 0x26f   : > { %1172 = vst.msk [vmem:[#allocation3 + $0xf8] sm:$0xff] %vm1140_vm7, %v1107_v25  ;;  %v1844_v14 = vpop.permute.xlu0 %1843 }
 0x270   : > { %1927 = vst.msk [vmem:[#allocation3 + $0x68] sm:$0xff] %vm1913_vm11, %v1844_v14 }
 0x272   : > { %v1298_v62 = vpop.permute.xlu1 %1297  ;;  %v1974_v2 = vld [vmem:[#allocation3 + $0xe0] sm:$0xff] }
 0x273   : > { %1364 = vst.msk [vmem:[#allocation3 + $0xf0] sm:$0xff] %vm1333_vm8, %v1298_v62  ;;  %2592 = vmatprep.mubr.msk.f32.mxu1 %vm1990_vm12, %v1974_v2  ;;  %v1268_v27 = vpop.permute.xlu0 %1267 }
 0x274   : > { %1349 = vst.msk [vmem:[#allocation3 + $0x78] sm:$0xff] %vm1333_vm8, %v1268_v27 }
 0x276   : > { %v1876_v13 = vpop.permute.xlu1 %1875 }
 0x277   : > { %1943 = vst.msk [vmem:[#allocation3 + $0xe8] sm:$0xff] %vm1913_vm11, %v1876_v13  ;;  %v1460_v42 = vpop.permute.xlu0 %1459  ;;  %v1959_v21 = vld [vmem:[#allocation3 + $0x68] sm:$0xff] }
 0x278   : > { %1542 = vst.msk [vmem:[#allocation3 + $0x70] sm:$0xff] %vm1527_vm9, %v1460_v42  ;;  %2569 = vmatmul.mubr.msk.f32.gmra.mrb[12].mxu0 %vm1990_vm12, %v1959_v21 }
 0x27a   : > { %v1300_v56 = vpop.permute.xlu1 %1299 }
 0x27b   : > { %1365 = vst.msk [vmem:[#allocation3 + $0xf8] sm:$0xff] %vm1333_vm8, %v1300_v56  ;;  %v1462_v34 = vpop.permute.xlu0 %1461 }
 0x27c   : > { %1543 = vst.msk [vmem:[#allocation3 + $0x78] sm:$0xff] %vm1527_vm9, %v1462_v34 }
 0x27e   : > { %v1492_v45 = vpop.permute.xlu1 %1491  ;;  %v1975_v29 = vld [vmem:[#allocation3 + $0xe8] sm:$0xff] }
 0x27f   : > { %1558 = vst.msk [vmem:[#allocation3 + $0xf0] sm:$0xff] %vm1527_vm9, %v1492_v45  ;;  %2593 = vmatmul.mubr.msk.f32.gmra.mrb[12].mxu1 %vm1990_vm12, %v1975_v29  ;;  %v1653_v38 = vpop.permute.xlu0 %1652 }
 0x280   : > { %1735 = vst.msk [vmem:[#allocation3 + $0x70] sm:$0xff] %vm1720_vm10, %v1653_v38 }
 0x282   : > { %v1494_v57 = vpop.permute.xlu1 %1493 }
 0x283   : > { %1559 = vst.msk [vmem:[#allocation3 + $0xf8] sm:$0xff] %vm1527_vm9, %v1494_v57  ;;  %v1655_v37 = vpop.permute.xlu0 %1654  ;;  %v2555_v19 = vpop.f32.mrb[2].mxu0 }
 0x284   : > { %1736 = vst.msk [vmem:[#allocation3 + $0x78] sm:$0xff] %vm1720_vm10, %v1655_v37  ;;  %v2173_v33 = vadd.f32 %v2555_v19, %v3650_v15  ;;  %v2167_v58 = vpop.f32.mrb[3].mxu0 }
 0x285   : > { %v2168_v11 = vadd.f32 %v3650_v15, %v2167_v58 }
 0x286   : > { %v1685_v20 = vpop.permute.xlu1 %1684  ;;  %2320 = vst.msk [vmem:[%s3658_s20 + $0x18] sm:$0xff] %vm2316_vm13, %v2173_v33 }
 0x287   : > { %1751 = vst.msk [vmem:[#allocation3 + $0xf0] sm:$0xff] %vm1720_vm10, %v1685_v20  ;;  %v1846_v41 = vpop.permute.xlu0 %1845 }
 0x288   : > { %2319 = vst.msk [vmem:[%s3658_s20 + $0x10] sm:$0xff] %vm2316_vm13, %v2168_v11 }
 0x289   : > { %1928 = vst.msk [vmem:[#allocation3 + $0x70] sm:$0xff] %vm1913_vm11, %v1846_v41 }
 0x28a   : > { %v2579_v6 = vpop.f32.mrb[2].mxu1  ;;  %v1687_v12 = vpop.permute.xlu1 %1686 }
 0x28b   : > { %v2253_v51 = vadd.f32 %v2579_v6, %v3650_v15  ;;  %1752 = vst.msk [vmem:[#allocation3 + $0xf8] sm:$0xff] %vm1720_vm10, %v1687_v12  ;;  %v2247_v7 = vpop.f32.mrb[3].mxu1  ;;  %v1848_v1 = vpop.permute.xlu0 %1847 }
 0x28c   : > { %v2248_v52 = vadd.f32 %v3650_v15, %v2247_v7  ;;  %1929 = vst.msk [vmem:[#allocation3 + $0x78] sm:$0xff] %vm1913_vm11, %v1848_v1 }
 0x28d   : > { %2336 = vst.msk [vmem:[%s3658_s20 + $0x98] sm:$0xff] %vm2316_vm13, %v2253_v51 }
 0x28e   : > { %2335 = vst.msk [vmem:[%s3658_s20 + $0x90] sm:$0xff] %vm2316_vm13, %v2248_v52  ;;  %v1878_v26 = vpop.permute.xlu1 %1877 }
 0x28f   : > { %1944 = vst.msk [vmem:[#allocation3 + $0xf0] sm:$0xff] %vm1913_vm11, %v1878_v26 }
 0x290   : > { %v1960_v4 = vld [vmem:[#allocation3 + $0x70] sm:$0xff] }
 0x291   : > { %2571 = vmatprep.mubr.msk.f32.mxu0 %vm1990_vm12, %v1960_v4 }
 0x292   : > { %v1880_v44 = vpop.permute.xlu1 %1879 }
 0x293   : > { %1945 = vst.msk [vmem:[#allocation3 + $0xf8] sm:$0xff] %vm1913_vm11, %v1880_v44  ;;  %v1961_v3 = vld [vmem:[#allocation3 + $0x78] sm:$0xff] }
 0x294   : > { %2572 = vmatmul.mubr.msk.f32.gmra.mrb[14].mxu0 %vm1990_vm12, %v1961_v3 }
 0x296   : > { %v1976_v10 = vld [vmem:[#allocation3 + $0xf0] sm:$0xff] }
 0x297   : > { %2595 = vmatprep.mubr.msk.f32.mxu1 %vm1990_vm12, %v1976_v10 }
 0x29a   : > { %v1977_v46 = vld [vmem:[#allocation3 + $0xf8] sm:$0xff] }
 0x29b   : > { %2596 = vmatmul.mubr.msk.f32.gmra.mrb[14].mxu1 %vm1990_vm12, %v1977_v46 }
 0x2ab   : > { %v2558_v5 = vpop.f32.mrb[4].mxu0 }
 0x2ac   : > { %v2183_v28 = vadd.f32 %v2558_v5, %v3650_v15  ;;  %v2177_v30 = vpop.f32.mrb[5].mxu0 }
 0x2ad   : > { %v2178_v49 = vadd.f32 %v3650_v15, %v2177_v30 }
 0x2ae   : > { %2322 = vst.msk [vmem:[%s3658_s20 + $0x28] sm:$0xff] %vm2316_vm13, %v2183_v28 }
 0x2af   : > { %2321 = vst.msk [vmem:[%s3658_s20 + $0x20] sm:$0xff] %vm2316_vm13, %v2178_v49 }
 0x2b2   : > { %v2582_v36 = vpop.f32.mrb[4].mxu1 }
 0x2b3   : > { %v2263_v39 = vadd.f32 %v2582_v36, %v3650_v15  ;;  %v2257_v31 = vpop.f32.mrb[5].mxu1 }
 0x2b4   : > { %v2258_v59 = vadd.f32 %v3650_v15, %v2257_v31 }
 0x2b5   : > { %2338 = vst.msk [vmem:[%s3658_s20 + $0xa8] sm:$0xff] %vm2316_vm13, %v2263_v39 }
 0x2b6   : > { %2337 = vst.msk [vmem:[%s3658_s20 + $0xa0] sm:$0xff] %vm2316_vm13, %v2258_v59 }
 0x2d3   : > { %v2561_v47 = vpop.f32.mrb[6].mxu0 }
 0x2d4   : > { %v2193_v48 = vadd.f32 %v2561_v47, %v3650_v15  ;;  %v2187_v60 = vpop.f32.mrb[7].mxu0 }
 0x2d5   : > { %v2188_v53 = vadd.f32 %v3650_v15, %v2187_v60 }
 0x2d6   : > { %2324 = vst.msk [vmem:[%s3658_s20 + $0x38] sm:$0xff] %vm2316_vm13, %v2193_v48 }
 0x2d7   : > { %2323 = vst.msk [vmem:[%s3658_s20 + $0x30] sm:$0xff] %vm2316_vm13, %v2188_v53 }
 0x2da   : > { %v2585_v40 = vpop.f32.mrb[6].mxu1 }
 0x2db   : > { %v2273_v17 = vadd.f32 %v2585_v40, %v3650_v15  ;;  %v2267_v16 = vpop.f32.mrb[7].mxu1 }
 0x2dc   : > { %v2268_v50 = vadd.f32 %v3650_v15, %v2267_v16 }
 0x2dd   : > { %2340 = vst.msk [vmem:[%s3658_s20 + $0xb8] sm:$0xff] %vm2316_vm13, %v2273_v17 }
 0x2de   : > { %2339 = vst.msk [vmem:[%s3658_s20 + $0xb0] sm:$0xff] %vm2316_vm13, %v2268_v50 }
 0x2fb   : > { %v2564_v63 = vpop.f32.mrb[8].mxu0 }
 0x2fc   : > { %v2203_v32 = vadd.f32 %v2564_v63, %v3650_v15  ;;  %v2197_v43 = vpop.f32.mrb[9].mxu0 }
 0x2fd   : > { %v2198_v18 = vadd.f32 %v3650_v15, %v2197_v43 }
 0x2fe   : > { %2326 = vst.msk [vmem:[%s3658_s20 + $0x48] sm:$0xff] %vm2316_vm13, %v2203_v32 }
 0x2ff   : > { %2325 = vst.msk [vmem:[%s3658_s20 + $0x40] sm:$0xff] %vm2316_vm13, %v2198_v18 }
 0x302   : > { %v2588_v61 = vpop.f32.mrb[8].mxu1 }
 0x303   : > { %v2283_v54 = vadd.f32 %v2588_v61, %v3650_v15  ;;  %v2277_v35 = vpop.f32.mrb[9].mxu1 }
 0x304   : > { %v2278_v55 = vadd.f32 %v3650_v15, %v2277_v35 }
 0x305   : > { %2342 = vst.msk [vmem:[%s3658_s20 + $0xc8] sm:$0xff] %vm2316_vm13, %v2283_v54 }
 0x306   : > { %2341 = vst.msk [vmem:[%s3658_s20 + $0xc0] sm:$0xff] %vm2316_vm13, %v2278_v55 }
 0x323   : > { %v2567_v8 = vpop.f32.mrb[10].mxu0 }
 0x324   : > { %v2213_v23 = vadd.f32 %v2567_v8, %v3650_v15  ;;  %v2207_v22 = vpop.f32.mrb[11].mxu0 }
 0x325   : > { %v2208_v9 = vadd.f32 %v3650_v15, %v2207_v22 }
 0x326   : > { %2328 = vst.msk [vmem:[%s3658_s20 + $0x58] sm:$0xff] %vm2316_vm13, %v2213_v23 }
 0x327   : > { %2327 = vst.msk [vmem:[%s3658_s20 + $0x50] sm:$0xff] %vm2316_vm13, %v2208_v9 }
 0x32a   : > { %v2591_v0 = vpop.f32.mrb[10].mxu1 }
 0x32b   : > { %v2293_v24 = vadd.f32 %v2591_v0, %v3650_v15  ;;  %v2287_v25 = vpop.f32.mrb[11].mxu1 }
 0x32c   : > { %v2288_v14 = vadd.f32 %v3650_v15, %v2287_v25 }
 0x32d   : > { %2344 = vst.msk [vmem:[%s3658_s20 + $0xd8] sm:$0xff] %vm2316_vm13, %v2293_v24 }
 0x32e   : > { %2343 = vst.msk [vmem:[%s3658_s20 + $0xd0] sm:$0xff] %vm2316_vm13, %v2288_v14 }
 0x34b   : > { %v2570_v62 = vpop.f32.mrb[12].mxu0 }
 0x34c   : > { %v2223_v2 = vadd.f32 %v2570_v62, %v3650_v15  ;;  %v2217_v27 = vpop.f32.mrb[13].mxu0 }
 0x34d   : > { %v2218_v13 = vadd.f32 %v3650_v15, %v2217_v27 }
 0x34e   : > { %2330 = vst.msk [vmem:[%s3658_s20 + $0x68] sm:$0xff] %vm2316_vm13, %v2223_v2 }
 0x34f   : > { %2329 = vst.msk [vmem:[%s3658_s20 + $0x60] sm:$0xff] %vm2316_vm13, %v2218_v13 }
 0x352   : > { %v2594_v42 = vpop.f32.mrb[12].mxu1 }
 0x353   : > { %v2303_v21 = vadd.f32 %v2594_v42, %v3650_v15  ;;  %v2297_v56 = vpop.f32.mrb[13].mxu1 }
 0x354   : > { %v2298_v34 = vadd.f32 %v3650_v15, %v2297_v56 }
 0x355   : > { %2346 = vst.msk [vmem:[%s3658_s20 + $0xe8] sm:$0xff] %vm2316_vm13, %v2303_v21 }
 0x356   : > { %2345 = vst.msk [vmem:[%s3658_s20 + $0xe0] sm:$0xff] %vm2316_vm13, %v2298_v34 }
 0x367   : > { %v2573_v45 = vpop.f32.mrb[14].mxu0 }
 0x368   : > { %v2233_v29 = vadd.f32 %v2573_v45, %v3650_v15  ;;  %v2227_v38 = vpop.f32.mrb[15].mxu0 }
 0x369   : > { %v2228_v57 = vadd.f32 %v3650_v15, %v2227_v38 }
 0x36a   : > { %2332 = vst.msk [vmem:[%s3658_s20 + $0x78] sm:$0xff] %vm2316_vm13, %v2233_v29 }
 0x36b   : > { %2331 = vst.msk [vmem:[%s3658_s20 + $0x70] sm:$0xff] %vm2316_vm13, %v2228_v57 }
 0x36e   : > { %v2597_v37 = vpop.f32.mrb[14].mxu1 }
 0x36f   : > { %v2313_v19 = vadd.f32 %v2597_v37, %v3650_v15  ;;  %v2307_v33 = vpop.f32.mrb[15].mxu1 }
 0x370   : > { %v2308_v58 = vadd.f32 %v3650_v15, %v2307_v33 }
 0x371   : > { %2348 = vst.msk [vmem:[%s3658_s20 + $0xf8] sm:$0xff] %vm2316_vm13, %v2313_v19 }
 0x372   : > { %2347 = vst.msk [vmem:[%s3658_s20 + $0xf0] sm:$0xff] %vm2316_vm13, %v2308_v58 }
 0x373 PF: > { %s13_s14 = sadd.s32 1, %s2667_s14   ;;  %s3804_s12 = smov %s2663_s13 }
 0x374   : > { %p10_p5 = scmp.ge.s32.totalorder %s13_s14, 4   ;;  %s3805_s13 = smov %s3807_s15 }
 0x376   :  { %12 = sbr.rel (!%p10_p5) target bundleno = 2 (0x2), region = 75 }

</bundles_post_ra>
